<compile_context>
chip_gen: v7x
topology: tpu7x:2x2x1
jax: 0.10.0
libtpu: 0.0.40
codegen_flags: <defaults>
</compile_context>

<pallas_src>
import functools

import jax
import jax.numpy as jnp
import numpy as np
from jax.experimental import pallas as pl
from jax.experimental.pallas import tpu as pltpu


# ============================================================================
# Fused Pallas kernel:  [conv3x3 -> BN(batch stats) -> LeakyReLU(0.2)] x 3
# ============================================================================
def _fused_kernel(x_ref, prev_ref, sx_ref, rowmask_ref,
                  b1x_ref, b1p_ref, b2_ref, b3_ref,
                  gamma_ref, beta_ref, tmat_ref, out_ref, *, inv_m):
    f32, bf16 = jnp.float32, jnp.bfloat16
    NH, WCo = out_ref.shape              # lane-dense (N*H, W*Co) output slab
    eps = 1e-5

    tmat = tmat_ref[...]                 # (WCo, WCo) bf16 0/1 reduce+broadcast
    mask_top = rowmask_ref[0]            # (NH, WCo) 0/1: source row h-1 valid
    mask_bot = rowmask_ref[1]            # (NH, WCo) 0/1: source row h+1 valid

    def conv_taps_roll(z):
        # z: (NH, 3*WCo) f32 banded-matmul result, one lane block per dy tap.
        # dy shift == sublane roll (XLU) + boundary mask (VPU); the mask also
        # blocks cross-image leakage through the circular roll.  Keeps the MXU
        # stream free for the big banded matmuls.
        top = pltpu.roll(z[:, 0:WCo], shift=1, axis=0)        # row h <- h-1
        mid = z[:, WCo:2 * WCo]
        bot = pltpu.roll(z[:, 2 * WCo:3 * WCo], shift=NH - 1, axis=0)  # h <- h+1
        return mask_top * top + mid + mask_bot * bot

    def bn_lrelu(acc, gamma_t, beta_t):
        # One-pass BatchNorm batch stats (biased variance, clamped >= 0) +
        # leaky_relu(0.2).  Elementwise math stays f32; only the tiny 0/1
        # reduce matmul (mean & E[x^2] fused into one dot) runs in bf16.
        s = jnp.sum(acc, axis=0, keepdims=True)               # (1, WCo)
        sq = jnp.sum(acc * acc, axis=0, keepdims=True)        # (1, WCo)
        stats = jnp.concatenate([s, sq], axis=0).astype(bf16)  # (2, WCo)
        red = jnp.dot(stats, tmat, preferred_element_type=f32) * inv_m
        mean, ex2 = red[0:1, :], red[1:2, :]
        var = jnp.maximum(ex2 - mean * mean, 0.0)
        scale = gamma_t * jax.lax.rsqrt(var + eps)
        y = (acc - mean) * scale + beta_t
        return jnp.where(y > 0, y, 0.2 * y)

    # ---- stage 1: conv1 over concat(upsample(x), prev) ----------------------
    # x branch: row upsample / zero padding / per-image blocks folded into ONE
    # bf16 Sx matmul (the three dy taps are K-concatenated; the three
    # lane-aligned z blocks are stacked vertically -> pure sublane copy).
    zx = jnp.dot(x_ref[...], b1x_ref[...], preferred_element_type=f32)
    z_stack = jnp.concatenate(
        [zx[:, 0:WCo], zx[:, WCo:2 * WCo], zx[:, 2 * WCo:3 * WCo]],
        axis=0).astype(bf16)                                  # (3*rows_x, WCo)
    acc1 = jnp.dot(sx_ref[...], z_stack, preferred_element_type=f32)
    # prev branch (full-res): roll-based dy taps.
    zp = jnp.dot(prev_ref[...], b1p_ref[...], preferred_element_type=f32)
    y1 = bn_lrelu(acc1 + conv_taps_roll(zp), gamma_ref[0], beta_ref[0])

    # ---- stage 2 -------------------------------------------------------------
    z2 = jnp.dot(y1.astype(bf16), b2_ref[...], preferred_element_type=f32)
    y2 = bn_lrelu(conv_taps_roll(z2), gamma_ref[1], beta_ref[1])

    # ---- stage 3 -------------------------------------------------------------
    z3 = jnp.dot(y2.astype(bf16), b3_ref[...], preferred_element_type=f32)
    y3 = bn_lrelu(conv_taps_roll(z3), gamma_ref[2], beta_ref[2])

    out_ref[...] = y3                    # single aligned, unmasked (32,128) store


# ============================================================================
# Host-side constant builders (trace-time, shapes are static)
# ============================================================================
def _sel_matrix_full(W):
    """sel[p, w, dx] = 1 iff full-res input column p feeds output col w, tap dx."""
    sel = np.zeros((W, W, 3), np.float32)
    for w in range(W):
        for dx in range(3):
            c = w - 1 + dx
            if 0 <= c < W:
                sel[c, w, dx] = 1.0
    return sel


def _sel_matrix_half(W):
    """Same, but input is half-width and nearest-2x column upsample is folded in."""
    sel = np.zeros((W // 2, W, 3), np.float32)
    for w in range(W):
        for dx in range(3):
            c = w - 1 + dx
            if 0 <= c < W:
                sel[c // 2, w, dx] = 1.0
    return sel


def _shift_matrices(N, H, rows_in, upsample):
    """S[dy, n*H+h, r_in]: 0/1 selection folding zero row-padding, optional
    nearest-2x row upsample, and per-image block structure."""
    Hi = rows_in // N
    S = np.zeros((3, N * H, rows_in), np.float32)
    for dy in range(3):
        for n in range(N):
            for h in range(H):
                hh = h - 1 + dy
                if 0 <= hh < H:
                    src = hh // 2 if upsample else hh
                    S[dy, n * H + h, n * Hi + src] = 1.0
    return S


def _row_masks(N, H, WCo):
    """0/1 per-row masks for the roll-based dy=0 / dy=2 taps (row padding and
    per-image boundaries).  Shape (2, N*H, WCo) f32."""
    h = np.arange(N * H) % H
    top = (h >= 1).astype(np.float32)[:, None]        # source row h-1 exists
    bot = (h <= H - 2).astype(np.float32)[:, None]    # source row h+1 exists
    return np.stack([np.broadcast_to(top, (N * H, WCo)),
                     np.broadcast_to(bot, (N * H, WCo))], axis=0).copy()


def _band_weights(w_hwio, sel):
    """Fold dx taps (+ column padding / upsample) of a 3x3 conv into a banded
    bf16 matrix B[p*Ci + ci, dy*W*Co + w*Co + co]."""
    P, W, _ = sel.shape
    Ci, Co = w_hwio.shape[2], w_hwio.shape[3]
    b = jnp.einsum('pwx,yxio->piywo', jnp.asarray(sel), w_hwio)
    return b.reshape(P * Ci, 3 * W * Co).astype(jnp.bfloat16)


# ----------------------------------------------------------------------------
# ID=1 upsampling branch (XLA glue, bf16 NHWC so it feeds the kernel directly)
# ----------------------------------------------------------------------------
def conv_transpose_2x_bf16(x_nhwc, w_iokk, bias):
    # Equivalent to PyTorch ConvTranspose2d(k=4, stride=2, pad=1):
    # conv(dilate(x,2), flip(W) with in/out swapped, pad = k-1-p = 2).
    w_flip = w_iokk[:, :, ::-1, ::-1]
    w_hwio = jnp.transpose(w_flip, (2, 3, 0, 1)).astype(jnp.bfloat16)
    y = jax.lax.conv_general_dilated(
        x_nhwc.astype(jnp.bfloat16), w_hwio, window_strides=(1, 1),
        padding=((2, 2), (2, 2)), lhs_dilation=(2, 2),
        dimension_numbers=('NHWC', 'HWIO', 'NHWC'))
    return y + bias.astype(jnp.bfloat16).reshape(1, 1, 1, -1)


def _conv_transpose_2x_f32(x_nhwc, w_iokk, bias):   # reference-path version
    w_hwio = jnp.transpose(w_iokk[:, :, ::-1, ::-1], (2, 3, 0, 1))
    y = jax.lax.conv_general_dilated(
        x_nhwc, w_hwio, window_strides=(1, 1),
        padding=((2, 2), (2, 2)), lhs_dilation=(2, 2),
        dimension_numbers=('NHWC', 'HWIO', 'NHWC'),
        precision=jax.lax.Precision.HIGHEST)
    return y + bias.reshape(1, 1, 1, -1)


def upsample_nearest_2x(x_nhwc):
    # nearest (ID=2) and area (ID=3) 2x upsample coincide for integer scale 2.
    return jnp.repeat(jnp.repeat(x_nhwc, 2, axis=1), 2, axis=2)


# ============================================================================
# Full UNet_up_block forward (NCHW in / NCHW out)
# ============================================================================
@functools.partial(jax.jit, static_argnames=('ID',))
def unet_up_block_forward(prev_feature_map_nchw, x_nchw, params, ID):
    N, Cp, H, W = prev_feature_map_nchw.shape
    Cin = x_nchw.shape[1]
    Co = params['w1'].shape[-1]
    WCo = W * Co

    # NCHW -> lane-dense (N*H, W*C) slabs (wrapper-side layout plumbing only).
    prev2d = (jnp.transpose(prev_feature_map_nchw, (0, 2, 3, 1))
              .reshape(N * H, W * Cp).astype(jnp.bfloat16))

    if ID == 1:
        x_up = conv_transpose_2x_bf16(jnp.transpose(x_nchw, (0, 2, 3, 1)),
                                      params['wt'], params['bt'])
        x2d = x_up.reshape(N * H, W * Cin)          # already bf16 NHWC
        sel_x = _sel_matrix_full(W)
        Sx = _shift_matrices(N, H, N * H, upsample=False)
        rows_x = N * H
    else:
        # ID=2/3: the 2x nearest/area upsample is folded into Sx (rows) and
        # B1x (columns); the upsampled tensor never exists in HBM.
        H2, W2 = H // 2, W // 2
        x2d = (jnp.transpose(x_nchw, (0, 2, 3, 1))
               .reshape(N * H2, W2 * Cin).astype(jnp.bfloat16))
        sel_x = _sel_matrix_half(W)
        Sx = _shift_matrices(N, H, N * H2, upsample=True)
        rows_x = N * H2

    sel_f = _sel_matrix_full(W)

    # torch.cat((x, prev), dim=1): w1's first Cin input channels act on x.
    B1x = _band_weights(params['w1'][:, :, :Cin, :], sel_x)
    B1p = _band_weights(params['w1'][:, :, Cin:, :], sel_f)
    B2 = _band_weights(params['w2'], sel_f)
    B3 = _band_weights(params['w3'], sel_f)

    # K-concatenated Sx for a single fused bf16 matmul in the kernel.
    Sx_cat = jnp.asarray(np.concatenate([Sx[0], Sx[1], Sx[2]], axis=1),
                         jnp.bfloat16)                    # (N*H, 3*rows_x)
    del rows_x

    # gamma/beta pre-tiled to the lane-dense (w, c) layout: (3, 1, W*Co) f32.
    gamma_t = jnp.stack([jnp.tile(params[k].reshape(1, Co), (1, W))
                         for k in ('g1', 'g2', 'g3')]).astype(jnp.float32)
    beta_t = jnp.stack([jnp.tile(params[k].reshape(1, Co), (1, W))
                        for k in ('b1', 'b2', 'b3')]).astype(jnp.float32)
    # Channel reduce+broadcast matrix (0/1 -> exact in bf16).
    tmat = jnp.asarray(np.tile(np.eye(Co, dtype=np.float32), (W, W)),
                       jnp.bfloat16)
    rowmask = jnp.asarray(_row_masks(N, H, WCo))          # (2, N*H, WCo) f32

    kernel = functools.partial(_fused_kernel, inv_m=1.0 / float(N * H * W))
    out2d = pl.pallas_call(
        kernel,
        out_shape=jax.ShapeDtypeStruct((N * H, WCo), jnp.float32),
        in_specs=[pl.BlockSpec(memory_space=pltpu.MemorySpace.VMEM)] * 11,
        out_specs=pl.BlockSpec(memory_space=pltpu.MemorySpace.VMEM),
    )(x2d, prev2d, Sx_cat, rowmask, B1x, B1p, B2, B3, gamma_t, beta_t, tmat)

    out = out2d.reshape(N, H, W, Co)
    return jnp.transpose(out, (0, 3, 1, 2))               # back to NCHW


# ============================================================================
# Pure-JAX reference (correctness check; f32 HIGHEST-precision convs)
# ============================================================================
def _ref_stage(x, w, gamma, beta):
    y = jax.lax.conv_general_dilated(
        x, w, (1, 1), ((1, 1), (1, 1)),
        dimension_numbers=('NHWC', 'HWIO', 'NHWC'),
        precision=jax.lax.Precision.HIGHEST)
    mean = jnp.mean(y, axis=(0, 1, 2), keepdims=True)
    var = jnp.mean((y - mean) ** 2, axis=(0, 1, 2), keepdims=True)
    y = (y - mean) * jax.lax.rsqrt(var + 1e-5) * gamma.reshape(1, 1, 1, -1) \
        + beta.reshape(1, 1, 1, -1)
    return jnp.where(y > 0, y, 0.2 * y)


def reference_forward(prev_nchw, x_nchw, params, ID):
    # NOTE: the ID=1 ConvTranspose2d uses the same (dilate + flipped-kernel
    # conv) formula in both paths, so only the fused conv/BN/LReLU pipeline is
    # independently validated for ID=1 (formula itself matches PyTorch).
    prev = jnp.transpose(prev_nchw, (0, 2, 3, 1))
    x = jnp.transpose(x_nchw, (0, 2, 3, 1))
    if ID == 1:
        x = _conv_transpose_2x_f32(x, params['wt'], params['bt'])
    else:
        x = upsample_nearest_2x(x)
    x = jnp.concatenate([x, prev], axis=-1)
    x = _ref_stage(x, params['w1'], params['g1'], params['b1'])
    x = _ref_stage(x, params['w2'], params['g2'], params['b2'])
    x = _ref_stage(x, params['w3'], params['g3'], params['b3'])
    return jnp.transpose(x, (0, 3, 1, 2))


# ============================================================================
if __name__ == "__main__":
    key = jax.random.PRNGKey(0)
    prev_channel, input_channel, output_channel = 4, 4, 8
    N, H, W = 2, 16, 16              # prev spatial size; x is H/2 x W/2

    ks = jax.random.split(key, 12)
    prev_feature_map = jax.random.normal(ks[0], (N, prev_channel, H, W), jnp.float32)
    x = jax.random.normal(ks[1], (N, input_channel, H // 2, W // 2), jnp.float32)

    cin1 = prev_channel + input_channel
    params = {
        # ConvTranspose2d(input_channel, input_channel, 4): (Cin, Cout, 4, 4) + bias
        'wt': 0.1 * jax.random.normal(ks[2], (input_channel, input_channel, 4, 4), jnp.float32),
        'bt': 0.1 * jax.random.normal(ks[3], (input_channel,), jnp.float32),
        # conv weights stored HWIO (3, 3, Cin, Co), no bias (matches bias=False)
        'w1': 0.1 * jax.random.normal(ks[4], (3, 3, cin1, output_channel), jnp.float32),
        'g1': 1.0 + 0.1 * jax.random.normal(ks[5], (output_channel,), jnp.float32),
        'b1': 0.1 * jax.random.normal(ks[6], (output_channel,), jnp.float32),
        'w2': 0.1 * jax.random.normal(ks[7], (3, 3, output_channel, output_channel), jnp.float32),
        'g2': 1.0 + 0.1 * jax.random.normal(ks[8], (output_channel,), jnp.float32),
        'b2': 0.1 * jax.random.normal(ks[9], (output_channel,), jnp.float32),
        'w3': 0.1 * jax.random.normal(ks[10], (3, 3, output_channel, output_channel), jnp.float32),
        'g3': 1.0 + 0.1 * jax.random.normal(ks[11], (output_channel,), jnp.float32),
        'b3': jnp.zeros((output_channel,), jnp.float32),
    }

    for ID in (2, 1, 3):             # exercise both half-res and full-res x paths
        out = jax.block_until_ready(unet_up_block_forward(prev_feature_map, x, params, ID))
        assert out.shape == (N, output_channel, H, W), out.shape
        ref = jax.block_until_ready(reference_forward(prev_feature_map, x, params, ID))
        # bf16 MXU operands vs f32 HIGHEST reference -> ~1e-2 relative differences.
        np.testing.assert_allclose(np.asarray(out), np.asarray(ref),
                                   rtol=2e-2, atol=2e-2)

    print("KERNEL_OK")
</pallas_src>

<mosaic_0001>
module attributes {stable_mosaic.version = 11 : i64} {
  func.func @_fused_kernel(%arg0: memref<16x32xbf16, #tpu.memory_space<vmem>>, %arg1: memref<32x64xbf16, #tpu.memory_space<vmem>>, %arg2: memref<32x48xbf16, #tpu.memory_space<vmem>>, %arg3: memref<2x32x128xf32, #tpu.memory_space<vmem>>, %arg4: memref<32x384xbf16, #tpu.memory_space<vmem>>, %arg5: memref<64x384xbf16, #tpu.memory_space<vmem>>, %arg6: memref<128x384xbf16, #tpu.memory_space<vmem>>, %arg7: memref<128x384xbf16, #tpu.memory_space<vmem>>, %arg8: memref<3x1x128xf32, #tpu.memory_space<vmem>>, %arg9: memref<3x1x128xf32, #tpu.memory_space<vmem>>, %arg10: memref<128x128xbf16, #tpu.memory_space<vmem>>, %arg11: memref<32x128xf32, #tpu.memory_space<vmem>>) attributes {dimension_semantics = [], scalar_prefetch = 0 : i64, scratch_operands = 0 : i64, tpu.core_type = #tpu.core_type<tc>} {
    %c0 = arith.constant 0 : index
    %c0_0 = arith.constant 0 : index
    %0 = vector.load %arg10[%c0, %c0_0] : memref<128x128xbf16, #tpu.memory_space<vmem>>, vector<128x128xbf16>
    %c0_1 = arith.constant 0 : index
    %c0_2 = arith.constant 0 : index
    %c0_3 = arith.constant 0 : index
    %1 = vector.load %arg3[%c0_1, %c0_2, %c0_3] : memref<2x32x128xf32, #tpu.memory_space<vmem>>, vector<1x32x128xf32>
    %2 = vector.shape_cast %1 : vector<1x32x128xf32> to vector<32x128xf32>
    %c1 = arith.constant 1 : index
    %c0_4 = arith.constant 0 : index
    %c0_5 = arith.constant 0 : index
    %3 = vector.load %arg3[%c1, %c0_4, %c0_5] : memref<2x32x128xf32, #tpu.memory_space<vmem>>, vector<1x32x128xf32>
    %4 = vector.shape_cast %3 : vector<1x32x128xf32> to vector<32x128xf32>
    %c0_6 = arith.constant 0 : index
    %c0_7 = arith.constant 0 : index
    %5 = vector.load %arg0[%c0_6, %c0_7] : memref<16x32xbf16, #tpu.memory_space<vmem>>, vector<16x32xbf16>
    %c0_8 = arith.constant 0 : index
    %c0_9 = arith.constant 0 : index
    %6 = vector.load %arg4[%c0_8, %c0_9] : memref<32x384xbf16, #tpu.memory_space<vmem>>, vector<32x384xbf16>
    %cst = arith.constant dense<0.000000e+00> : vector<16x384xf32>
    %7 = tpu.matmul %5, %6, %cst {dimension_numbers = #tpu.dot_dimension_numbers<[1], [0], [0], [1], [0, 0, 1, 1], [], []>} : vector<16x32xbf16>, vector<32x384xbf16>, vector<16x384xf32> -> vector<16x384xf32>
    %8 = vector.extract_strided_slice %7 {offsets = [0, 0], sizes = [16, 128], strides = [1, 1]} : vector<16x384xf32> to vector<16x128xf32>
    %9 = vector.extract_strided_slice %7 {offsets = [0, 128], sizes = [16, 128], strides = [1, 1]} : vector<16x384xf32> to vector<16x128xf32>
    %10 = vector.extract_strided_slice %7 {offsets = [0, 256], sizes = [16, 128], strides = [1, 1]} : vector<16x384xf32> to vector<16x128xf32>
    %11 = tpu.concatenate %8, %9, %10 in 0 : vector<16x128xf32>, vector<16x128xf32>, vector<16x128xf32> -> vector<48x128xf32>
    %12 = arith.truncf %11 : vector<48x128xf32> to vector<48x128xbf16>
    %c0_10 = arith.constant 0 : index
    %c0_11 = arith.constant 0 : index
    %13 = vector.load %arg2[%c0_10, %c0_11] : memref<32x48xbf16, #tpu.memory_space<vmem>>, vector<32x48xbf16>
    %cst_12 = arith.constant dense<0.000000e+00> : vector<32x128xf32>
    %14 = tpu.matmul %13, %12, %cst_12 {dimension_numbers = #tpu.dot_dimension_numbers<[1], [0], [0], [1], [0, 0, 1, 1], [], []>} : vector<32x48xbf16>, vector<48x128xbf16>, vector<32x128xf32> -> vector<32x128xf32>
    %c0_13 = arith.constant 0 : index
    %c0_14 = arith.constant 0 : index
    %15 = vector.load %arg1[%c0_13, %c0_14] : memref<32x64xbf16, #tpu.memory_space<vmem>>, vector<32x64xbf16>
    %c0_15 = arith.constant 0 : index
    %c0_16 = arith.constant 0 : index
    %16 = vector.load %arg5[%c0_15, %c0_16] : memref<64x384xbf16, #tpu.memory_space<vmem>>, vector<64x384xbf16>
    %cst_17 = arith.constant dense<0.000000e+00> : vector<32x384xf32>
    %17 = tpu.matmul %15, %16, %cst_17 {dimension_numbers = #tpu.dot_dimension_numbers<[1], [0], [0], [1], [0, 0, 1, 1], [], []>} : vector<32x64xbf16>, vector<64x384xbf16>, vector<32x384xf32> -> vector<32x384xf32>
    %18 = vector.extract_strided_slice %17 {offsets = [0, 0], sizes = [32, 128], strides = [1, 1]} : vector<32x384xf32> to vector<32x128xf32>
    %c1_i32 = arith.constant 1 : i32
    %19 = tpu.dynamic_rotate %18 by %c1_i32 dim 0 : vector<32x128xf32>, i32 -> vector<32x128xf32>
    %20 = vector.extract_strided_slice %17 {offsets = [0, 128], sizes = [32, 128], strides = [1, 1]} : vector<32x384xf32> to vector<32x128xf32>
    %21 = vector.extract_strided_slice %17 {offsets = [0, 256], sizes = [32, 128], strides = [1, 1]} : vector<32x384xf32> to vector<32x128xf32>
    %c31_i32 = arith.constant 31 : i32
    %22 = tpu.dynamic_rotate %21 by %c31_i32 dim 0 : vector<32x128xf32>, i32 -> vector<32x128xf32>
    %23 = arith.mulf %2, %19 : vector<32x128xf32>
    %24 = arith.addf %23, %20 : vector<32x128xf32>
    %25 = arith.mulf %4, %22 : vector<32x128xf32>
    %26 = arith.addf %24, %25 : vector<32x128xf32>
    %27 = arith.addf %14, %26 : vector<32x128xf32>
    %c0_18 = arith.constant 0 : index
    %c0_19 = arith.constant 0 : index
    %c0_20 = arith.constant 0 : index
    %28 = vector.load %arg8[%c0_18, %c0_19, %c0_20] : memref<3x1x128xf32, #tpu.memory_space<vmem>>, vector<1x1x128xf32>
    %29 = vector.shape_cast %28 : vector<1x1x128xf32> to vector<1x128xf32>
    %c0_21 = arith.constant 0 : index
    %c0_22 = arith.constant 0 : index
    %c0_23 = arith.constant 0 : index
    %30 = vector.load %arg9[%c0_21, %c0_22, %c0_23] : memref<3x1x128xf32, #tpu.memory_space<vmem>>, vector<1x1x128xf32>
    %31 = vector.shape_cast %30 : vector<1x1x128xf32> to vector<1x128xf32>
    %cst_24 = arith.constant dense<0.000000e+00> : vector<128xf32>
    %32 = vector.multi_reduction <add>, %27, %cst_24 [0] : vector<32x128xf32> to vector<128xf32>
    %33 = vector.shape_cast %32 : vector<128xf32> to vector<1x128xf32>
    %34 = arith.mulf %27, %27 : vector<32x128xf32>
    %cst_25 = arith.constant dense<0.000000e+00> : vector<128xf32>
    %35 = vector.multi_reduction <add>, %34, %cst_25 [0] : vector<32x128xf32> to vector<128xf32>
    %36 = vector.shape_cast %35 : vector<128xf32> to vector<1x128xf32>
    %37 = tpu.concatenate %33, %36 in 0 : vector<1x128xf32>, vector<1x128xf32> -> vector<2x128xf32>
    %38 = arith.truncf %37 : vector<2x128xf32> to vector<2x128xbf16>
    %cst_26 = arith.constant dense<0.000000e+00> : vector<2x128xf32>
    %39 = tpu.matmul %38, %0, %cst_26 {dimension_numbers = #tpu.dot_dimension_numbers<[1], [0], [0], [1], [0, 0, 1, 1], [], []>} : vector<2x128xbf16>, vector<128x128xbf16>, vector<2x128xf32> -> vector<2x128xf32>
    %cst_27 = arith.constant 0.001953125 : f32
    %40 = vector.broadcast %cst_27 : f32 to vector<2x128xf32>
    %41 = arith.mulf %39, %40 : vector<2x128xf32>
    %42 = vector.extract_strided_slice %41 {offsets = [0, 0], sizes = [1, 128], strides = [1, 1]} : vector<2x128xf32> to vector<1x128xf32>
    %43 = vector.extract_strided_slice %41 {offsets = [1, 0], sizes = [1, 128], strides = [1, 1]} : vector<2x128xf32> to vector<1x128xf32>
    %44 = arith.mulf %42, %42 : vector<1x128xf32>
    %45 = arith.subf %43, %44 : vector<1x128xf32>
    %cst_28 = arith.constant 0.000000e+00 : f32
    %46 = vector.broadcast %cst_28 : f32 to vector<1x128xf32>
    %47 = arith.maximumf %45, %46 : vector<1x128xf32>
    %cst_29 = arith.constant 9.99999974E-6 : f32
    %48 = vector.broadcast %cst_29 : f32 to vector<1x128xf32>
    %49 = arith.addf %47, %48 : vector<1x128xf32>
    %50 = math.rsqrt %49 : vector<1x128xf32>
    %51 = arith.mulf %29, %50 : vector<1x128xf32>
    %52 = vector.broadcast %42 : vector<1x128xf32> to vector<32x128xf32>
    %53 = arith.subf %27, %52 : vector<32x128xf32>
    %54 = vector.broadcast %51 : vector<1x128xf32> to vector<32x128xf32>
    %55 = arith.mulf %53, %54 : vector<32x128xf32>
    %56 = vector.broadcast %31 : vector<1x128xf32> to vector<32x128xf32>
    %57 = arith.addf %55, %56 : vector<32x128xf32>
    %cst_30 = arith.constant 0.000000e+00 : f32
    %58 = vector.broadcast %cst_30 : f32 to vector<32x128xf32>
    %59 = arith.cmpf ogt, %57, %58 : vector<32x128xf32>
    %cst_31 = arith.constant 2.000000e-01 : f32
    %60 = vector.broadcast %cst_31 : f32 to vector<32x128xf32>
    %61 = arith.mulf %60, %57 : vector<32x128xf32>
    %62 = arith.select %59, %57, %61 : vector<32x128xi1>, vector<32x128xf32>
    %63 = arith.truncf %62 : vector<32x128xf32> to vector<32x128xbf16>
    %c0_32 = arith.constant 0 : index
    %c0_33 = arith.constant 0 : index
    %64 = vector.load %arg6[%c0_32, %c0_33] : memref<128x384xbf16, #tpu.memory_space<vmem>>, vector<128x384xbf16>
    %cst_34 = arith.constant dense<0.000000e+00> : vector<32x384xf32>
    %65 = tpu.matmul %63, %64, %cst_34 {dimension_numbers = #tpu.dot_dimension_numbers<[1], [0], [0], [1], [0, 0, 1, 1], [], []>} : vector<32x128xbf16>, vector<128x384xbf16>, vector<32x384xf32> -> vector<32x384xf32>
    %66 = vector.extract_strided_slice %65 {offsets = [0, 0], sizes = [32, 128], strides = [1, 1]} : vector<32x384xf32> to vector<32x128xf32>
    %c1_i32_35 = arith.constant 1 : i32
    %67 = tpu.dynamic_rotate %66 by %c1_i32_35 dim 0 : vector<32x128xf32>, i32 -> vector<32x128xf32>
    %68 = vector.extract_strided_slice %65 {offsets = [0, 128], sizes = [32, 128], strides = [1, 1]} : vector<32x384xf32> to vector<32x128xf32>
    %69 = vector.extract_strided_slice %65 {offsets = [0, 256], sizes = [32, 128], strides = [1, 1]} : vector<32x384xf32> to vector<32x128xf32>
    %c31_i32_36 = arith.constant 31 : i32
    %70 = tpu.dynamic_rotate %69 by %c31_i32_36 dim 0 : vector<32x128xf32>, i32 -> vector<32x128xf32>
    %71 = arith.mulf %2, %67 : vector<32x128xf32>
    %72 = arith.addf %71, %68 : vector<32x128xf32>
    %73 = arith.mulf %4, %70 : vector<32x128xf32>
    %74 = arith.addf %72, %73 : vector<32x128xf32>
    %c1_37 = arith.constant 1 : index
    %c0_38 = arith.constant 0 : index
    %c0_39 = arith.constant 0 : index
    %75 = vector.load %arg8[%c1_37, %c0_38, %c0_39] : memref<3x1x128xf32, #tpu.memory_space<vmem>>, vector<1x1x128xf32>
    %76 = vector.shape_cast %75 : vector<1x1x128xf32> to vector<1x128xf32>
    %c1_40 = arith.constant 1 : index
    %c0_41 = arith.constant 0 : index
    %c0_42 = arith.constant 0 : index
    %77 = vector.load %arg9[%c1_40, %c0_41, %c0_42] : memref<3x1x128xf32, #tpu.memory_space<vmem>>, vector<1x1x128xf32>
    %78 = vector.shape_cast %77 : vector<1x1x128xf32> to vector<1x128xf32>
    %cst_43 = arith.constant dense<0.000000e+00> : vector<128xf32>
    %79 = vector.multi_reduction <add>, %74, %cst_43 [0] : vector<32x128xf32> to vector<128xf32>
    %80 = vector.shape_cast %79 : vector<128xf32> to vector<1x128xf32>
    %81 = arith.mulf %74, %74 : vector<32x128xf32>
    %cst_44 = arith.constant dense<0.000000e+00> : vector<128xf32>
    %82 = vector.multi_reduction <add>, %81, %cst_44 [0] : vector<32x128xf32> to vector<128xf32>
    %83 = vector.shape_cast %82 : vector<128xf32> to vector<1x128xf32>
    %84 = tpu.concatenate %80, %83 in 0 : vector<1x128xf32>, vector<1x128xf32> -> vector<2x128xf32>
    %85 = arith.truncf %84 : vector<2x128xf32> to vector<2x128xbf16>
    %cst_45 = arith.constant dense<0.000000e+00> : vector<2x128xf32>
    %86 = tpu.matmul %85, %0, %cst_45 {dimension_numbers = #tpu.dot_dimension_numbers<[1], [0], [0], [1], [0, 0, 1, 1], [], []>} : vector<2x128xbf16>, vector<128x128xbf16>, vector<2x128xf32> -> vector<2x128xf32>
    %cst_46 = arith.constant 0.001953125 : f32
    %87 = vector.broadcast %cst_46 : f32 to vector<2x128xf32>
    %88 = arith.mulf %86, %87 : vector<2x128xf32>
    %89 = vector.extract_strided_slice %88 {offsets = [0, 0], sizes = [1, 128], strides = [1, 1]} : vector<2x128xf32> to vector<1x128xf32>
    %90 = vector.extract_strided_slice %88 {offsets = [1, 0], sizes = [1, 128], strides = [1, 1]} : vector<2x128xf32> to vector<1x128xf32>
    %91 = arith.mulf %89, %89 : vector<1x128xf32>
    %92 = arith.subf %90, %91 : vector<1x128xf32>
    %cst_47 = arith.constant 0.000000e+00 : f32
    %93 = vector.broadcast %cst_47 : f32 to vector<1x128xf32>
    %94 = arith.maximumf %92, %93 : vector<1x128xf32>
    %cst_48 = arith.constant 9.99999974E-6 : f32
    %95 = vector.broadcast %cst_48 : f32 to vector<1x128xf32>
    %96 = arith.addf %94, %95 : vector<1x128xf32>
    %97 = math.rsqrt %96 : vector<1x128xf32>
    %98 = arith.mulf %76, %97 : vector<1x128xf32>
    %99 = vector.broadcast %89 : vector<1x128xf32> to vector<32x128xf32>
    %100 = arith.subf %74, %99 : vector<32x128xf32>
    %101 = vector.broadcast %98 : vector<1x128xf32> to vector<32x128xf32>
    %102 = arith.mulf %100, %101 : vector<32x128xf32>
    %103 = vector.broadcast %78 : vector<1x128xf32> to vector<32x128xf32>
    %104 = arith.addf %102, %103 : vector<32x128xf32>
    %cst_49 = arith.constant 0.000000e+00 : f32
    %105 = vector.broadcast %cst_49 : f32 to vector<32x128xf32>
    %106 = arith.cmpf ogt, %104, %105 : vector<32x128xf32>
    %cst_50 = arith.constant 2.000000e-01 : f32
    %107 = vector.broadcast %cst_50 : f32 to vector<32x128xf32>
    %108 = arith.mulf %107, %104 : vector<32x128xf32>
    %109 = arith.select %106, %104, %108 : vector<32x128xi1>, vector<32x128xf32>
    %110 = arith.truncf %109 : vector<32x128xf32> to vector<32x128xbf16>
    %c0_51 = arith.constant 0 : index
    %c0_52 = arith.constant 0 : index
    %111 = vector.load %arg7[%c0_51, %c0_52] : memref<128x384xbf16, #tpu.memory_space<vmem>>, vector<128x384xbf16>
    %cst_53 = arith.constant dense<0.000000e+00> : vector<32x384xf32>
    %112 = tpu.matmul %110, %111, %cst_53 {dimension_numbers = #tpu.dot_dimension_numbers<[1], [0], [0], [1], [0, 0, 1, 1], [], []>} : vector<32x128xbf16>, vector<128x384xbf16>, vector<32x384xf32> -> vector<32x384xf32>
    %113 = vector.extract_strided_slice %112 {offsets = [0, 0], sizes = [32, 128], strides = [1, 1]} : vector<32x384xf32> to vector<32x128xf32>
    %c1_i32_54 = arith.constant 1 : i32
    %114 = tpu.dynamic_rotate %113 by %c1_i32_54 dim 0 : vector<32x128xf32>, i32 -> vector<32x128xf32>
    %115 = vector.extract_strided_slice %112 {offsets = [0, 128], sizes = [32, 128], strides = [1, 1]} : vector<32x384xf32> to vector<32x128xf32>
    %116 = vector.extract_strided_slice %112 {offsets = [0, 256], sizes = [32, 128], strides = [1, 1]} : vector<32x384xf32> to vector<32x128xf32>
    %c31_i32_55 = arith.constant 31 : i32
    %117 = tpu.dynamic_rotate %116 by %c31_i32_55 dim 0 : vector<32x128xf32>, i32 -> vector<32x128xf32>
    %118 = arith.mulf %2, %114 : vector<32x128xf32>
    %119 = arith.addf %118, %115 : vector<32x128xf32>
    %120 = arith.mulf %4, %117 : vector<32x128xf32>
    %121 = arith.addf %119, %120 : vector<32x128xf32>
    %c2 = arith.constant 2 : index
    %c0_56 = arith.constant 0 : index
    %c0_57 = arith.constant 0 : index
    %122 = vector.load %arg8[%c2, %c0_56, %c0_57] : memref<3x1x128xf32, #tpu.memory_space<vmem>>, vector<1x1x128xf32>
    %123 = vector.shape_cast %122 : vector<1x1x128xf32> to vector<1x128xf32>
    %c2_58 = arith.constant 2 : index
    %c0_59 = arith.constant 0 : index
    %c0_60 = arith.constant 0 : index
    %124 = vector.load %arg9[%c2_58, %c0_59, %c0_60] : memref<3x1x128xf32, #tpu.memory_space<vmem>>, vector<1x1x128xf32>
    %125 = vector.shape_cast %124 : vector<1x1x128xf32> to vector<1x128xf32>
    %cst_61 = arith.constant dense<0.000000e+00> : vector<128xf32>
    %126 = vector.multi_reduction <add>, %121, %cst_61 [0] : vector<32x128xf32> to vector<128xf32>
    %127 = vector.shape_cast %126 : vector<128xf32> to vector<1x128xf32>
    %128 = arith.mulf %121, %121 : vector<32x128xf32>
    %cst_62 = arith.constant dense<0.000000e+00> : vector<128xf32>
    %129 = vector.multi_reduction <add>, %128, %cst_62 [0] : vector<32x128xf32> to vector<128xf32>
    %130 = vector.shape_cast %129 : vector<128xf32> to vector<1x128xf32>
    %131 = tpu.concatenate %127, %130 in 0 : vector<1x128xf32>, vector<1x128xf32> -> vector<2x128xf32>
    %132 = arith.truncf %131 : vector<2x128xf32> to vector<2x128xbf16>
    %cst_63 = arith.constant dense<0.000000e+00> : vector<2x128xf32>
    %133 = tpu.matmul %132, %0, %cst_63 {dimension_numbers = #tpu.dot_dimension_numbers<[1], [0], [0], [1], [0, 0, 1, 1], [], []>} : vector<2x128xbf16>, vector<128x128xbf16>, vector<2x128xf32> -> vector<2x128xf32>
    %cst_64 = arith.constant 0.001953125 : f32
    %134 = vector.broadcast %cst_64 : f32 to vector<2x128xf32>
    %135 = arith.mulf %133, %134 : vector<2x128xf32>
    %136 = vector.extract_strided_slice %135 {offsets = [0, 0], sizes = [1, 128], strides = [1, 1]} : vector<2x128xf32> to vector<1x128xf32>
    %137 = vector.extract_strided_slice %135 {offsets = [1, 0], sizes = [1, 128], strides = [1, 1]} : vector<2x128xf32> to vector<1x128xf32>
    %138 = arith.mulf %136, %136 : vector<1x128xf32>
    %139 = arith.subf %137, %138 : vector<1x128xf32>
    %cst_65 = arith.constant 0.000000e+00 : f32
    %140 = vector.broadcast %cst_65 : f32 to vector<1x128xf32>
    %141 = arith.maximumf %139, %140 : vector<1x128xf32>
    %cst_66 = arith.constant 9.99999974E-6 : f32
    %142 = vector.broadcast %cst_66 : f32 to vector<1x128xf32>
    %143 = arith.addf %141, %142 : vector<1x128xf32>
    %144 = math.rsqrt %143 : vector<1x128xf32>
    %145 = arith.mulf %123, %144 : vector<1x128xf32>
    %146 = vector.broadcast %136 : vector<1x128xf32> to vector<32x128xf32>
    %147 = arith.subf %121, %146 : vector<32x128xf32>
    %148 = vector.broadcast %145 : vector<1x128xf32> to vector<32x128xf32>
    %149 = arith.mulf %147, %148 : vector<32x128xf32>
    %150 = vector.broadcast %125 : vector<1x128xf32> to vector<32x128xf32>
    %151 = arith.addf %149, %150 : vector<32x128xf32>
    %cst_67 = arith.constant 0.000000e+00 : f32
    %152 = vector.broadcast %cst_67 : f32 to vector<32x128xf32>
    %153 = arith.cmpf ogt, %151, %152 : vector<32x128xf32>
    %cst_68 = arith.constant 2.000000e-01 : f32
    %154 = vector.broadcast %cst_68 : f32 to vector<32x128xf32>
    %155 = arith.mulf %154, %151 : vector<32x128xf32>
    %156 = arith.select %153, %151, %155 : vector<32x128xi1>, vector<32x128xf32>
    %c0_69 = arith.constant 0 : index
    %c0_70 = arith.constant 0 : index
    %157 = vector.load %arg11[%c0_69, %c0_70] : memref<32x128xf32, #tpu.memory_space<vmem>>, vector<32x128xf32>
    tpu.vector_store %arg11[%c0_69, %c0_70], %156 {strides = array<i32>} : memref<32x128xf32, #tpu.memory_space<vmem>>, vector<32x128xf32>,
    return
  }
}

</mosaic_0001>

<bundles_post_ra>
// kernel: unet_up_block_forward.1
= control target key start
LH: loop header
LB: loop body
LE: loop exit
PB: predicated region body
PF: predicated region fallthrough
CT: control target
= control target key end

     0   :  { %v1966_v1 = vmov 0   ;;  %vm111_vm0 = vcmask 261120   ;;  %v1967_v10 = vmov 0.0   ;;  %vm1968_vm1 = vmmov 0   ;;  %s2583_s4 = inlined_call_operand.vmem [shape: bf16[32,384], index: 4, kind: input, shape index: {}]   ;;  %s2584_s0 = inlined_call_operand.vmem [shape: bf16[16,32], index: 0, kind: input, shape index: {}]   ;;  %s2585_s5 = inlined_call_operand.vmem [shape: bf16[64,384], index: 5, kind: input, shape index: {}]   ;;  %s2586_s1 = inlined_call_operand.vmem [shape: bf16[32,64], index: 1, kind: input, shape index: {}]   ;;  %s2587_s2 = inlined_call_operand.vmem [shape: bf16[32,48], index: 2, kind: input, shape index: {}]   ;;  %s2588_s10 = inlined_call_operand.vmem [shape: bf16[128,128], index: 10, kind: input, shape index: {}]   ;;  %s2589_s3 = inlined_call_operand.vmem [shape: f32[2,32,128], index: 3, kind: input, shape index: {}]   ;;  %s2590_s6 = inlined_call_operand.vmem [shape: bf16[128,384], index: 6, kind: input, shape index: {}]   ;;  %s2591_s8 = inlined_call_operand.vmem [shape: f32[3,1,128], index: 8, kind: input, shape index: {}]   ;;  %s2592_s9 = inlined_call_operand.vmem [shape: f32[3,1,128], index: 9, kind: input, shape index: {}]   ;;  %s2593_s7 = inlined_call_operand.vmem [shape: bf16[128,384], index: 7, kind: input, shape index: {}]   ;;  %s2594_s11 = inlined_call_operand.vmem [shape: f32[32,128], index: 11, kind: output, shape index: {}]  }
   0x1   :  { %v1856_v0 = vld [vmem:[%s2583_s4 + $0x4] ss:$12 sps:$4 sm:$0xff]   ;;  %147 = vmatprep.mubr.bf16.mxu1 %v1966_v1  ;;  %339 = vmatprep.mubr.bf16.mxu0 %v1966_v1  ;;  %v1858_v2 = vld [vmem:[%s2583_s4] ss:$12 sps:$4 sm:$0xff]   ;;  %v1859_v3 = vld [vmem:[%s2583_s4 + $0x1c] ss:$12 sps:$4 sm:$0xff]   ;;  %v413_v32 = vlaneseq }
   0x2   :  { %115 = vmatprep.subr.bf16.mxu1 %v1856_v0  ;;  %v1861_v4 = vld [vmem:[%s2583_s4 + $0x18] ss:$12 sps:$4 sm:$0xff]   ;;  %v1863_v6 = vld [vmem:[%s2583_s4 + $0x8] ss:$12 sps:$4 sm:$0xff]   ;;  %v1867_v8 = vld [vmem:[%s2585_s5] ss:$12 sps:$4 sm:$0xff]  }
   0x3   :  { %116 = vmatpush1.bf16.msra.mxu1 %v1858_v2  ;;  %v1862_v5 = vld [vmem:[%s2584_s0] sm:$0xff]   ;;  %v1868_v9 = vld [vmem:[%s2585_s5 + $0x1c] ss:$12 sps:$4 sm:$0xff]   ;;  %v1875_v16 = vld [vmem:[%s2585_s5 + $0x4c] ss:$12 sps:$4 sm:$0xff]   ;;  %vm300_vm2 = vcmask 523264  }
   0x4   :  { %117 = vmatprep.subr.bf16.mxu1 %v1859_v3  ;;  %v1865_v7 = vld [vmem:[%s2585_s5 + $0x4] ss:$12 sps:$4 sm:$0xff]   ;;  %v1871_v12 = vld [vmem:[%s2585_s5 + $0x34] ss:$12 sps:$4 sm:$0xff]   ;;  %v1882_v22 = vld [vmem:[%s2586_s1 + $0x8] sm:$0xff]   ;;  %vm455_vm3 = vcmask 392192  }
   0x5   :  { %307 = vmatprep.subr.bf16.mxu0 %v1865_v7  ;;  %v1870_v11 = vld [vmem:[%s2585_s5 + $0x18] ss:$12 sps:$4 sm:$0xff]   ;;  %v1864_v13 = vld [vmem:[%s2583_s4 + $0x20] ss:$12 sps:$4 sm:$0xff]   ;;  %v1874_v14 = vld [vmem:[%s2585_s5 + $0x8] ss:$12 sps:$4 sm:$0xff]  }
   0x6   :  { %308 = vmatpush1.bf16.msra.mxu0 %v1867_v8  ;;  %v1873_v15 = vld [vmem:[%s2585_s5 + $0x30] ss:$12 sps:$4 sm:$0xff]   ;;  %v1878_v17 = vld [vmem:[%s2585_s5 + $0x20] ss:$12 sps:$4 sm:$0xff]   ;;  %v1877_v18 = vld [vmem:[%s2585_s5 + $0x48] ss:$12 sps:$4 sm:$0xff]  }
   0x7   :  { %118 = vmatpush1.bf16.msra.mxu1 %v1861_v4  ;;  %309 = vmatprep.subr.bf16.mxu0 %v1868_v9  ;;  %v1879_v19 = vld [vmem:[%s2586_s1] sm:$0xff]   ;;  %v1881_v21 = vld [vmem:[%s2585_s5 + $0x50] ss:$12 sps:$4 sm:$0xff]   ;;  %v2120_v37 = vshrl.u32 %v413_v32, 7  ;;  %v1884_v38 = vld [vmem:[%s2587_s2 + $0x8] sm:$0xff]   ;;  %vm535_vm6 = vcmask 1040384  }
   0x8   :  { %1722 = vmatprep.subr.bf16.mxu1 %v1967_v10  ;;  %v1880_v20 = vld [vmem:[%s2585_s5 + $0x38] ss:$12 sps:$4 sm:$0xff]   ;;  %v2130_v44 = vld [vmem:[%s2589_s3 + $0x8] sm:$0xff]  ;;  %v2139_v51 = vld [vmem:[%s2589_s3 + $0x10] sm:$0xff] }
   0x9   :  { %v1883_v23 = vld [vmem:[%s2587_s2] sm:$0xff]   ;;  %vm415_vm4 = vcmp.lt.s32.totalorder %v2120_v37, 1  ;;  %v2146_v58 = vld [vmem:[%s2589_s3 + $0x18] sm:$0xff]  ;;  %vm424_vm5 = vcmp.lt.s32.totalorder %v2120_v37, 7 }
   0xa   :  { %1574 = vmatmul.mubr.msk.bf16.vlgmr.msra.gmra.mrb[0].mxu1 %vm111_vm0, %v1862_v5  ;;  %310 = vmatpush1.bf16.msra.mxu0 %v1870_v11  ;;  %v2116_v24 = vld [vmem:[%s2588_s10] sm:$0xff]   ;;  %v2210_v32 = vld [vmem:[%s2588_s10 + $0x18] sm:$0xff]  }
   0xb   :  { %1723 = vmatpush3.bf16.msra.mxu1 %v1863_v6  ;;  %1726 = vmatprep.mubr.msk.bf16.mxu1 %vm1968_vm1, %v1967_v10 }
   0xc   :  { %1724 = vmatprep.subr.bf16.mxu1 %v1967_v10  ;;  %311 = vmatprep.subr.bf16.mxu0 %v1871_v12 }
   0xe   :  { %312 = vmatpush1.bf16.msra.mxu0 %v1873_v15 }
   0xf   :  { %1725 = vmatpush3.bf16.msra.mxu1 %v1864_v13  ;;  %313 = vmatprep.subr.bf16.mxu0 %v1875_v16 }
  0x10   :  { %1730 = vmatprep.subr.bf16.mxu1 %v1874_v14 }
  0x12   :  { %1727 = vmatmul.mubr.msk.bf16.vlgmr.msra.gmra.mrb[4].mxu1 %vm111_vm0, %v1862_v5  ;;  %314 = vmatpush1.bf16.msra.mxu0 %v1877_v18  ;;  %v2157_v5 = vld [vmem:[%s2589_s3 + $0x30] sm:$0xff] }
  0x13   :  { %1731 = vmatpush3.bf16.msra.mxu1 %v1874_v14  ;;  %1738 = vmatprep.mubr.msk.bf16.mxu1 %vm300_vm2, %v1879_v19 }
  0x14   :  { %1732 = vmatprep.subr.bf16.mxu1 %v1878_v17  ;;  %1752 = vmatprep.subr.bf16.mxu0 %v1967_v10 }
  0x15   :  { %1590 = vmatmul.mubr.msk.bf16.vlgmr.msra.gmra.mrb[0].mxu0 %vm300_vm2, %v1879_v19  ;;  %v2178_v19 = vld [vmem:[%s2589_s3 + $0x20] sm:$0xff] }
  0x16   :  { %349 = vmatprep.mubr.bf16.mxu0 %v1966_v1  ;;  %1753 = vmatpush3.bf16.msra.mxu0 %v2116_v24 }
  0x17   :  { %1733 = vmatpush3.bf16.msra.mxu1 %v1878_v17  ;;  %1754 = vmatprep.subr.bf16.mxu0 %v1967_v10  ;;  %v2172_v17 = vld [vmem:[%s2589_s3] sm:$0xff] }
  0x18   :  { %1734 = vmatprep.subr.bf16.mxu1 %v1880_v20 }
  0x1b   :  { %1735 = vmatpush3.bf16.msra.mxu1 %v1880_v20  ;;  %v2183_v20 = vld [vmem:[%s2589_s3 + $0x28] sm:$0xff] }
  0x1c   :  { %1736 = vmatprep.subr.bf16.mxu1 %v1881_v21 }
  0x1d   :  { %1591 = vmatmul.mubr.msk.bf16.gmra.mrb[4].mxu0 %vm300_vm2, %v1882_v22 }
  0x1e   :  { %1768 = vmatprep.mubr.msk.bf16.mxu0 %vm1968_vm1, %v1967_v10 }
  0x1f   :  { %1737 = vmatpush3.bf16.msra.mxu1 %v1881_v21 }
  0x22   :  { %1739 = vmatmul.mubr.msk.bf16.vlgmr.msra.gmra.mrb[8].mxu1 %vm300_vm2, %v1882_v22 }
  0x23   :  { %1748 = vmatprep.mubr.msk.bf16.mxu1 %vm455_vm3, %v1883_v23 }
  0xdd   :  { %v149_v25 = vpop.f32.mrb[0].mxu1 }
  0xde   :  { %v151_v26 = vpop.f32.mrb[1].mxu1 }
  0xdf   :  { %v153_v27 = vpop.f32.mrb[2].mxu1 }
  0xe0   :  { %v199_v28 = vpack.c.bf16 %v153_v27, %v149_v25  ;;  %v155_v29 = vpop.f32.mrb[3].mxu1  ;;  %v2190_v27 = vld [vmem:[%s2589_s3 + $0x38] sm:$0xff] }
  0xe1   :  { %v200_v30 = vpack.c.bf16 %v155_v29, %v151_v26 }
  0xe2   :  { %1742 = vmatprep.subr.bf16.mxu1 %v199_v28 }
  0xe3   :  { %1743 = vmatpush3.bf16.msra.mxu1 %v199_v28 }
  0xe4   :  { %1744 = vmatprep.subr.bf16.mxu1 %v200_v30 }
  0xe5   :  { %v192_v31 = vpop.f32.mrb[4].mxu1 }
  0xe6   :  { %v1728_v33 = vpop.f32.mrb[5].mxu1 }
  0xe7   :  { %v195_v34 = vpop.f32.mrb[6].mxu1  ;;  %1745 = vmatpush3.bf16.msra.mxu1 %v200_v30  ;;  %v2196_v30 = vld [vmem:[%s2588_s10 + $0x8] sm:$0xff]   ;;  %v2217_v33 = vld [vmem:[%s2588_s10 + $0x20] sm:$0xff]  }
  0xe8   :  { %v201_v35 = vpack.c.bf16 %v195_v34, %v192_v31  ;;  %v1729_v36 = vpop.f32.mrb[7].mxu1  ;;  %v341_v39 = vpop.f32.mrb[0].mxu0  ;;  %1755 = vmatpush3.bf16.msra.mxu0 %v2196_v30  ;;  %v2203_v31 = vld [vmem:[%s2588_s10 + $0x10] sm:$0xff]   ;;  %v2224_v34 = vld [vmem:[%s2588_s10 + $0x28] sm:$0xff]  }
  0xe9   :  { %v409_v40 = vrot.slane %v341_v39, 7  ;;  %v343_v41 = vpop.f32.mrb[1].mxu0  ;;  %1756 = vmatprep.subr.bf16.mxu0 %v1967_v10  ;;  %v2237_v36 = vld [vmem:[%s2588_s10 + $0x38] sm:$0xff]  }
  0xea   :  { %1746 = vmatprep.subr.bf16.mxu1 %v201_v35  ;;  %v345_v42 = vpop.f32.mrb[2].mxu0 }
  0xeb   :  { %1747 = vmatpush3.bf16.msra.mxu1 %v201_v35  ;;  %v410_v43 = vrot.slane %v345_v42, 7  ;;  %v347_v45 = vpop.f32.mrb[3].mxu0  ;;  %v2231_v35 = vld [vmem:[%s2588_s10 + $0x30] sm:$0xff]  }
  0xec   :  { %1757 = vmatpush3.bf16.msra.mxu0 %v2203_v31 }
  0xed   :  { %v418_v46 = vsel %vm415_vm4, %v409_v40, %v410_v43  ;;  %1758 = vmatprep.subr.bf16.mxu0 %v1967_v10 }
  0xee   :  { %1749 = vmatmul.mubr.msk.bf16.vlgmr.msra.gmra.mrb[12].mxu1 %vm455_vm3, %v1884_v38  ;;  %v430_v47 = vmul.f32 %v418_v46, %v2130_v44 }
  0xef   :  { %887 = vmatprep.mubr.bf16.mxu1 %v1966_v1 }
  0xf0   :  { %v434_v48 = vadd.f32 %v430_v47, %v347_v45  ;;  %v351_v49 = vpop.f32.mrb[4].mxu0  ;;  %1759 = vmatpush3.bf16.msra.mxu0 %v2210_v32 }
  0xf1   :  { %v411_v50 = vrot.slane %v351_v49, 7  ;;  %v353_v52 = vpop.f32.mrb[5].mxu0  ;;  %1760 = vmatprep.subr.bf16.mxu0 %v1967_v10 }
  0xf2   :  { %v355_v54 = vpop.f32.mrb[6].mxu0 }
  0xf3   :  { %v417_v55 = vsel %vm415_vm4, %v410_v43, %v411_v50  ;;  %v412_v56 = vrot.slane %v355_v54, 7  ;;  %v357_v59 = vpop.f32.mrb[7].mxu0 }
  0xf4   :  { %v431_v60 = vmul.f32 %v417_v55, %v2139_v51  ;;  %1761 = vmatpush3.bf16.msra.mxu0 %v2217_v33 }
  0xf5   :  { %v1740_v53 = vpop.f32.mrb[8].mxu1  ;;  %v419_v0 = vsel %vm415_vm4, %v412_v56, %v409_v40  ;;  %v416_v4 = vsel %vm415_vm4, %v411_v50, %v412_v56  ;;  %1762 = vmatprep.subr.bf16.mxu0 %v1967_v10 }
  0xf6   :  { %v394_v57 = vpop.f32.mrb[9].mxu1  ;;  %v422_v61 = vrot.slane %v1740_v53, 1  ;;  %v435_v6 = vadd.f32 %v431_v60, %v353_v52  ;;  %v432_v8 = vmul.f32 %v416_v4, %v2146_v58  ;;  %v429_v18 = vmul.f32 %v419_v0, %v2172_v17 }
  0xf7   :  { %v420_v62 = vrot.slane %v394_v57, 1  ;;  %v1741_v63 = vpop.f32.mrb[10].mxu1 }
  0xf8   :  { %v423_v2 = vrot.slane %v1741_v63, 1  ;;  %v397_v3 = vpop.f32.mrb[11].mxu1  ;;  %v436_v14 = vadd.f32 %v432_v8, %v357_v59  ;;  %v433_v21 = vadd.f32 %v429_v18, %v343_v41  ;;  %1763 = vmatpush3.bf16.msra.mxu0 %v2224_v34  ;;  %v1900_v18 = vld [vmem:[%s2590_s6 + $0x20] ss:$12 sps:$4 sm:$0xff]  }
  0xf9   :  { %v421_v7 = vrot.slane %v397_v3, 1  ;;  %1764 = vmatprep.subr.bf16.mxu0 %v1967_v10 }
  0xfa   :  { %v425_v9 = vsel %vm424_vm5, %v422_v61, %v423_v2  ;;  %v428_v11 = vsel %vm424_vm5, %v423_v2, %v420_v62 }
  0xfb   :  { %v426_v12 = vsel %vm424_vm5, %v421_v7, %v422_v61  ;;  %v427_v13 = vsel %vm424_vm5, %v420_v62, %v421_v7  ;;  %v439_v15 = vmul.f32 %v2157_v5, %v425_v9  ;;  %v440_v28 = vmul.f32 %v2190_v27, %v428_v11 }
  0xfc   :  { %v437_v22 = vmul.f32 %v2178_v19, %v427_v13  ;;  %v438_v23 = vmul.f32 %v2183_v20, %v426_v12  ;;  %1765 = vmatpush3.bf16.msra.mxu0 %v2231_v35  ;;  %v1895_v12 = vld [vmem:[%s2590_s6 + $0x4] ss:$12 sps:$4 sm:$0xff]   ;;  %v1893_v13 = vld [vmem:[%s2590_s6] ss:$12 sps:$4 sm:$0xff]  }
  0xfd   :  { %v443_v16 = vadd.f32 %v439_v15, %v435_v6  ;;  %v444_v29 = vadd.f32 %v440_v28, %v436_v14  ;;  %1766 = vmatprep.subr.bf16.mxu0 %v1967_v10  ;;  %855 = vmatprep.subr.bf16.mxu1 %v1895_v12  ;;  %v1896_v14 = vld [vmem:[%s2590_s6 + $0x8] ss:$12 sps:$4 sm:$0xff]   ;;  %v1908_v28 = vld [vmem:[%s2590_s6 + $0x50] ss:$12 sps:$4 sm:$0xff]  }
  0xfe   :  { %v441_v25 = vadd.f32 %v437_v22, %v433_v21  ;;  %v442_v26 = vadd.f32 %v438_v23, %v434_v48  ;;  %856 = vmatpush1.bf16.msra.mxu1 %v1893_v13  ;;  %v1899_v15 = vld [vmem:[%s2590_s6 + $0x1c] ss:$12 sps:$4 sm:$0xff]   ;;  %v1903_v21 = vld [vmem:[%s2590_s6 + $0x34] ss:$12 sps:$4 sm:$0xff]   ;;  %v1904_v23 = vld [vmem:[%s2590_s6 + $0x38] ss:$12 sps:$4 sm:$0xff]  }
  0xff   :  { %857 = vmatprep.subr.bf16.mxu1 %v1899_v15  ;;  %v1901_v22 = vld [vmem:[%s2590_s6 + $0x30] ss:$12 sps:$4 sm:$0xff]   ;;  %v511_v13 = vld [vmem:[%s2591_s8] sm:$0x1] }
 0x100   :  { %1767 = vmatpush3.bf16.msra.mxu0 %v2237_v36 }
 0x101   :  { %1772 = vmatprep.subr.bf16.mxu0 %v1896_v14 }
 0x1c1   :  { %v1750_v38 = vpop.f32.mrb[12].mxu1 }
 0x1c2   :  { %v2241_v39 = vadd.f32 %v1750_v38, %v443_v16  ;;  %v496_v40 = vpop.f32.mrb[13].mxu1  ;;  %v1897_v16 = vld [vmem:[%s2590_s6 + $0x18] ss:$12 sps:$4 sm:$0xff]   ;;  %v1909_v38 = vld [vmem:[%s2590_s6 + $0x60] ss:$12 sps:$4 sm:$0xff]  }
 0x1c3   :  { %v2243_v41 = vadd.f32 %v496_v40, %v441_v25  ;;  %v1751_v42 = vpop.f32.mrb[14].mxu1  ;;  %858 = vmatpush1.bf16.msra.mxu1 %v1897_v16  ;;  %v1907_v25 = vld [vmem:[%s2590_s6 + $0x4c] ss:$12 sps:$4 sm:$0xff]   ;;  %v1912_v40 = vld [vmem:[%s2590_s6 + $0x68] ss:$12 sps:$4 sm:$0xff]  }
 0x1c4   :  { %v2245_v43 = vadd.f32 %v1751_v42, %v444_v29  ;;  %v499_v45 = vpop.f32.mrb[15].mxu1  ;;  %v524_v50 = vmul.f32 %v2241_v39, %v2241_v39  ;;  %859 = vmatprep.subr.bf16.mxu1 %v1903_v21  ;;  %v1911_v29 = vld [vmem:[%s2590_s6 + $0x64] ss:$12 sps:$4 sm:$0xff]  }
 0x1c5   :  { %v2247_v46 = vadd.f32 %v499_v45, %v442_v26  ;;  %v522_v47 = vmul.f32 %v2243_v41, %v2243_v41  ;;  %v1905_v26 = vld [vmem:[%s2590_s6 + $0x48] ss:$12 sps:$4 sm:$0xff]   ;;  %v1913_v42 = vld [vmem:[%s2590_s6 + $0x78] ss:$12 sps:$4 sm:$0xff]  }
 0x1c6   :  { %v525_v54 = vmul.f32 %v2245_v43, %v2245_v43  ;;  %v1915_v45 = vld [vmem:[%s2590_s6 + $0x7c] ss:$12 sps:$4 sm:$0xff]  }
 0x1c7   :  { %v513_v48 = vadd.f32 %v2247_v46, %v2243_v41  ;;  %v523_v49 = vmul.f32 %v2247_v46, %v2247_v46  ;;  %860 = vmatpush1.bf16.msra.mxu1 %v1901_v22 }
 0x1c8   :  { %861 = vmatprep.subr.bf16.mxu1 %v1907_v25 }
 0x1c9   :  { %v514_v52 = vadd.f32 %v513_v48, %v2241_v39  ;;  %v526_v53 = vadd.f32 %v523_v49, %v522_v47  ;;  %v1916_v47 = vld [vmem:[%s2590_s6 + $0x80] ss:$12 sps:$4 sm:$0xff]   ;;  %v1920_v49 = vld [vmem:[%s2590_s6 + $0x98] ss:$12 sps:$4 sm:$0xff]  }
 0x1ca   :  { %v1919_v48 = vld [vmem:[%s2590_s6 + $0x94] ss:$12 sps:$4 sm:$0xff]  }
 0x1cb   :  { %v515_v55 = vadd.f32 %v514_v52, %v2245_v43  ;;  %v527_v56 = vadd.f32 %v526_v53, %v524_v50  ;;  %862 = vmatpush1.bf16.msra.mxu1 %v1905_v26  ;;  %v1917_v50 = vld [vmem:[%s2590_s6 + $0x90] ss:$12 sps:$4 sm:$0xff]   ;;  %v1923_v52 = vld [vmem:[%s2590_s6 + $0xac] ss:$12 sps:$4 sm:$0xff]   ;;  %v1606_v26 = vld [vmem:[%s2592_s9] ss:$0 sm:$0xff] }
 0x1cc   :  { %863 = vmatprep.subr.bf16.mxu1 %v1911_v29  ;;  %v1924_v53 = vld [vmem:[%s2590_s6 + $0xb0] ss:$12 sps:$4 sm:$0xff]  }
 0x1cd   :  { %v516_v57 = vrot.slane %v515_v55, 4  ;;  %v528_v59 = vadd.f32 %v527_v56, %v525_v54  ;;  %v1921_v54 = vld [vmem:[%s2590_s6 + $0xa8] ss:$12 sps:$4 sm:$0xff]  }
 0x1cf   :  { %v517_v60 = vadd.f32 %v516_v57, %v515_v55  ;;  %v529_v61 = vrot.slane %v528_v59, 4  ;;  %864 = vmatpush1.bf16.msra.mxu1 %v1909_v38 }
 0x1d0   :  { %865 = vmatprep.subr.bf16.mxu1 %v1915_v45 }
 0x1d1   :  { %v518_v62 = vrot.slane %v517_v60, 2  ;;  %v530_v63 = vadd.f32 %v529_v61, %v528_v59 }
 0x1d3   :  { %v519_v0 = vadd.f32 %v518_v62, %v517_v60  ;;  %v531_v2 = vrot.slane %v530_v63, 2  ;;  %866 = vmatpush1.bf16.msra.mxu1 %v1913_v42 }
 0x1d4   :  { %867 = vmatprep.subr.bf16.mxu1 %v1919_v48 }
 0x1d5   :  { %v520_v3 = vrot.slane %v519_v0, 1  ;;  %v532_v4 = vadd.f32 %v531_v2, %v530_v63 }
 0x1d7   :  { %v533_v6 = vrot.slane %v532_v4, 1  ;;  %v521_v7 = vadd.f32 %v520_v3, %v519_v0  ;;  %868 = vmatpush1.bf16.msra.mxu1 %v1917_v50  ;;  %v1969_v3 = vmov 1966171168  }
 0x1d8   :  { %869 = vmatprep.subr.bf16.mxu1 %v1923_v52 }
 0x1d9   :  { %v534_v8 = vadd.f32 %v533_v6, %v532_v4  ;;  %v637_v4 = vunpack.c.l.s4 %v1969_v3 }
 0x1db   :  { %v536_v9 = vsel %vm535_vm6, %v521_v7, %v534_v8  ;;  %870 = vmatpush1.bf16.msra.mxu1 %v1921_v54  ;;  %v638_v6 = vunpack.c.0.s8 %v637_v4 }
 0x1dc   :  { %v537_v11 = vpack.c.bf16 %v536_v9, %v536_v9  ;;  %1792 = vmatprep.subr.bf16.mxu1 %v1967_v10  ;;  %v2339_v9 = vsub.s32 0, %v2120_v37 }
 0x1dd   :  { %v2336_v7 = vsub.s32 %v638_v6, %v2120_v37 }
 0x1de   :  { %1769 = vmatmul.mubr.bf16.vlgmr.msra.gmra.mrb[8].mxu0 %v537_v11 }
 0x1df   :  { %1773 = vmatpush3.bf16.msra.mxu0 %v1896_v14 }
 0x1e0   :  { %1774 = vmatprep.subr.bf16.mxu0 %v1900_v18 }
 0x1e3   :  { %1775 = vmatpush3.bf16.msra.mxu0 %v1900_v18 }
 0x1e4   :  { %1776 = vmatprep.subr.bf16.mxu0 %v1904_v23 }
 0x1e7   :  { %1777 = vmatpush3.bf16.msra.mxu0 %v1904_v23 }
 0x1e8   :  { %1778 = vmatprep.subr.bf16.mxu0 %v1908_v28 }
 0x1eb   :  { %1779 = vmatpush3.bf16.msra.mxu0 %v1908_v28 }
 0x1ec   :  { %1780 = vmatprep.subr.bf16.mxu0 %v1912_v40 }
 0x1ef   :  { %1781 = vmatpush3.bf16.msra.mxu0 %v1912_v40 }
 0x1f0   :  { %1782 = vmatprep.subr.bf16.mxu0 %v1916_v47 }
 0x1f3   :  { %1783 = vmatpush3.bf16.msra.mxu0 %v1916_v47 }
 0x1f4   :  { %1784 = vmatprep.subr.bf16.mxu0 %v1920_v49 }
 0x1f7   :  { %1785 = vmatpush3.bf16.msra.mxu0 %v1920_v49 }
 0x1f8   :  { %1786 = vmatprep.subr.bf16.mxu0 %v1924_v53 }
 0x1fb   :  { %1787 = vmatpush3.bf16.msra.mxu0 %v1924_v53 }
 0x2b1   :  { %v620_v55 = vpop.f32.mrb[8].mxu0 }
 0x2b2   :  { %v626_v56 = vmul.f32 0.001953125, %v620_v55  ;;  %v1770_v57 = vpop.f32.mrb[9].mxu0 }
 0x2b3   :  { %v623_v59 = vpop.f32.mrb[10].mxu0 }
 0x2b4   :  { %v627_v60 = vmul.f32 %v626_v56, %v626_v56  ;;  %v1771_v61 = vpop.f32.mrb[11].mxu0  ;;  %v656_v14 = vrot.slane %v626_v56, %v2339_v9 }
 0x2b6   :  { %v629_v62 = vrot.slane %v627_v60, 7  ;;  %v657_v18 = vsub.f32 %v2243_v41, %v656_v14  ;;  %v658_v21 = vsub.f32 %v2247_v46, %v656_v14  ;;  %v659_v22 = vsub.f32 %v2241_v39, %v656_v14 }
 0x2b7   :  { %v660_v23 = vsub.f32 %v2245_v43, %v656_v14 }
 0x2b8   :  { %v631_v63 = vsub.f32 %v626_v56, %v629_v62 }
 0x2ba   :  { %v632_v0 = vmax.f32 %v631_v63, 0.0 }
 0x2bc   :  { %v633_v2 = vadd.f32 1e-05, %v632_v0 }
 0x2be   :  { %1957 = vrsqrt.f32 %v633_v2 }
 0x2c8   :  { %v1958_v8 = vpop.eup %1957 }
 0x2c9   :  { %v642_v11 = vrot.slane %v1958_v8, %v2336_v7 }
 0x2cb   :  { %v643_v12 = vcombine.high %v642_v11, %v642_v11 }
 0x2cd   :  { %v650_v15 = vrot.slane %v643_v12, %v2336_v7 }
 0x2cf   :  { %v652_v16 = vmul.f32 %v650_v15, %v511_v13 }
 0x2d1   :  { %v665_v25 = vrot.slane %v652_v16, %v2339_v9 }
 0x2d3   :  { %v667_v28 = vmul.f32 %v665_v25, %v657_v18  ;;  %v668_v29 = vmul.f32 %v665_v25, %v658_v21  ;;  %v669_v38 = vmul.f32 %v665_v25, %v659_v22  ;;  %v670_v40 = vmul.f32 %v665_v25, %v660_v23 }
 0x2d5   :  { %v677_v42 = vadd.f32 %v1606_v26, %v667_v28  ;;  %v678_v45 = vadd.f32 %v1606_v26, %v668_v29  ;;  %v679_v47 = vadd.f32 %v1606_v26, %v669_v38  ;;  %v680_v41 = vadd.f32 %v1606_v26, %v670_v40 }
 0x2d7   :  { %vm681_vm7 = vcmp.gt.f32.partialorder %v677_v42, 0.0  ;;  %vm682_vm8 = vcmp.gt.f32.partialorder %v678_v45, 0.0  ;;  %v685_v46 = vmul.f32 0.2, %v677_v42  ;;  %v686_v39 = vmul.f32 0.2, %v678_v45 }
 0x2d8   :  { %vm683_vm9 = vcmp.gt.f32.partialorder %v679_v47, 0.0  ;;  %vm684_vm10 = vcmp.gt.f32.partialorder %v680_v41, 0.0  ;;  %v687_v43 = vmul.f32 0.2, %v679_v47  ;;  %v688_v48 = vmul.f32 0.2, %v680_v41 }
 0x2d9   :  { %v689_v49 = vsel %vm681_vm7, %v677_v42, %v685_v46  ;;  %v690_v50 = vsel %vm682_vm8, %v678_v45, %v686_v39 }
 0x2da   :  { %v693_v52 = vpack.c.bf16 %v690_v50, %v689_v49  ;;  %v691_v53 = vsel %vm683_vm9, %v679_v47, %v687_v43  ;;  %v692_v54 = vsel %vm684_vm10, %v680_v41, %v688_v48 }
 0x2db   :  { %v694_v55 = vpack.c.bf16 %v692_v54, %v691_v53 }
 0x2dc   :  { %888 = vmatmul.mubr.bf16.vlgmr.msra.gmra.mrb[16].mxu1 %v693_v52  ;;  %1788 = vmatprep.mubr.bf16.mxu0 %v693_v52 }
 0x2dd   :  { %1789 = vmatmul.mubr.bf16.vlgmr.msra.gmra.mrb[12].mxu0 %v694_v55  ;;  %897 = vmatprep.mubr.bf16.mxu1 %v1966_v1 }
 0x2de   :  { %1793 = vmatpush3.bf16.msra.mxu1 %v2116_v24  ;;  %1318 = vmatprep.mubr.bf16.mxu0 %v1966_v1 }
 0x2df   :  { %1794 = vmatprep.subr.bf16.mxu1 %v1967_v10 }
 0x2e2   :  { %1795 = vmatpush3.bf16.msra.mxu1 %v2196_v30 }
 0x2e3   :  { %1796 = vmatprep.subr.bf16.mxu1 %v1967_v10 }
 0x2e4   :  { %898 = vmatmul.mubr.bf16.gmra.mrb[20].mxu1 %v694_v55 }
 0x2e5   :  { %1808 = vmatprep.mubr.msk.bf16.mxu1 %vm1968_vm1, %v1967_v10 }
 0x2e6   :  { %1797 = vmatpush3.bf16.msra.mxu1 %v2203_v31 }
 0x2e7   :  { %1798 = vmatprep.subr.bf16.mxu1 %v1967_v10 }
 0x2ea   :  { %1799 = vmatpush3.bf16.msra.mxu1 %v2210_v32 }
 0x2eb   :  { %1800 = vmatprep.subr.bf16.mxu1 %v1967_v10 }
 0x2ee   :  { %1801 = vmatpush3.bf16.msra.mxu1 %v2217_v33 }
 0x2ef   :  { %1802 = vmatprep.subr.bf16.mxu1 %v1967_v10 }
 0x2f2   :  { %1803 = vmatpush3.bf16.msra.mxu1 %v2224_v34 }
 0x2f3   :  { %1804 = vmatprep.subr.bf16.mxu1 %v1967_v10 }
 0x2f6   :  { %1805 = vmatpush3.bf16.msra.mxu1 %v2231_v35 }
 0x2f7   :  { %1806 = vmatprep.subr.bf16.mxu1 %v1967_v10 }
 0x2fa   :  { %1807 = vmatpush3.bf16.msra.mxu1 %v2237_v36 }
 0x3af   :  { %v889_v24 = vpop.f32.mrb[16].mxu1 }
 0x3b0   :  { %v891_v56 = vpop.f32.mrb[17].mxu1  ;;  %v1790_v57 = vpop.f32.mrb[12].mxu0  ;;  %v957_v61 = vrot.slane %v889_v24, 7 }
 0x3b1   :  { %v893_v59 = vpop.f32.mrb[18].mxu1  ;;  %v942_v60 = vpop.f32.mrb[13].mxu0  ;;  %v967_v3 = vrot.slane %v1790_v57, 1 }
 0x3b2   :  { %v958_v62 = vrot.slane %v893_v59, 7  ;;  %v965_v63 = vrot.slane %v942_v60, 1  ;;  %v895_v0 = vpop.f32.mrb[19].mxu1  ;;  %v1791_v2 = vpop.f32.mrb[14].mxu0 }
 0x3b3   :  { %v968_v4 = vrot.slane %v1791_v2, 1  ;;  %v945_v6 = vpop.f32.mrb[15].mxu0 }
 0x3b4   :  { %v963_v8 = vsel %vm415_vm4, %v957_v61, %v958_v62  ;;  %v966_v11 = vrot.slane %v945_v6, 1 }
 0x3b5   :  { %v974_v12 = vmul.f32 %v963_v8, %v2130_v44  ;;  %v969_v13 = vsel %vm424_vm5, %v967_v3, %v968_v4  ;;  %v972_v14 = vsel %vm424_vm5, %v968_v4, %v965_v63 }
 0x3b6   :  { %v970_v15 = vsel %vm424_vm5, %v966_v11, %v967_v3  ;;  %v971_v16 = vsel %vm424_vm5, %v965_v63, %v966_v11  ;;  %v983_v46 = vmul.f32 %v2157_v5, %v969_v13  ;;  %v984_v48 = vmul.f32 %v2190_v27, %v972_v14 }
 0x3b7   :  { %v978_v18 = vadd.f32 %v974_v12, %v895_v0  ;;  %v982_v21 = vmul.f32 %v2183_v20, %v970_v15  ;;  %v899_v22 = vpop.f32.mrb[20].mxu1  ;;  %v981_v49 = vmul.f32 %v2178_v19, %v971_v16 }
 0x3b8   :  { %v959_v23 = vrot.slane %v899_v22, 7  ;;  %v901_v25 = vpop.f32.mrb[21].mxu1  ;;  %v1927_v22 = vld [vmem:[%s2593_s7 + $0x4] ss:$12 sps:$4 sm:$0xff]  }
 0x3b9   :  { %v2386_v26 = vadd.f32 %v982_v21, %v978_v18  ;;  %v903_v28 = vpop.f32.mrb[22].mxu1  ;;  %1286 = vmatprep.subr.bf16.mxu0 %v1927_v22 }
 0x3ba   :  { %v962_v29 = vsel %vm415_vm4, %v958_v62, %v959_v23  ;;  %v960_v38 = vrot.slane %v903_v28, 7  ;;  %v905_v40 = vpop.f32.mrb[23].mxu1  ;;  %v1931_v28 = vld [vmem:[%s2593_s7 + $0x1c] ss:$12 sps:$4 sm:$0xff]  }
 0x3bb   :  { %v975_v42 = vmul.f32 %v962_v29, %v2139_v51  ;;  %v1003_v55 = vmul.f32 %v2386_v26, %v2386_v26  ;;  %v1929_v29 = vld [vmem:[%s2593_s7 + $0x18] ss:$12 sps:$4 sm:$0xff]  }
 0x3bc   :  { %v964_v45 = vsel %vm415_vm4, %v960_v38, %v957_v61  ;;  %v961_v47 = vsel %vm415_vm4, %v959_v23, %v960_v38  ;;  %v1925_v23 = vld [vmem:[%s2593_s7] ss:$12 sps:$4 sm:$0xff]  }
 0x3bd   :  { %v979_v41 = vadd.f32 %v975_v42, %v901_v25  ;;  %v973_v39 = vmul.f32 %v964_v45, %v2172_v17  ;;  %v976_v43 = vmul.f32 %v961_v47, %v2146_v58  ;;  %v1928_v25 = vld [vmem:[%s2593_s7 + $0x8] ss:$12 sps:$4 sm:$0xff]   ;;  %1287 = vmatpush1.bf16.msra.mxu0 %v1925_v23  ;;  %v1932_v38 = vld [vmem:[%s2593_s7 + $0x20] ss:$12 sps:$4 sm:$0xff]   ;;  %v1933_v42 = vld [vmem:[%s2593_s7 + $0x30] ss:$12 sps:$4 sm:$0xff]  }
 0x3be   :  { %1812 = vmatprep.subr.bf16.mxu1 %v1928_v25  ;;  %1288 = vmatprep.subr.bf16.mxu0 %v1931_v28  ;;  %v1936_v45 = vld [vmem:[%s2593_s7 + $0x38] ss:$12 sps:$4 sm:$0xff]  }
 0x3bf   :  { %v2400_v50 = vadd.f32 %v983_v46, %v979_v41  ;;  %v977_v51 = vadd.f32 %v973_v39, %v891_v56  ;;  %v980_v52 = vadd.f32 %v976_v43, %v905_v40  ;;  %v1935_v40 = vld [vmem:[%s2593_s7 + $0x34] ss:$12 sps:$4 sm:$0xff]   ;;  %v1939_v47 = vld [vmem:[%s2593_s7 + $0x4c] ss:$12 sps:$4 sm:$0xff]   ;;  %v1940_v46 = vld [vmem:[%s2593_s7 + $0x50] ss:$12 sps:$4 sm:$0xff]  }
 0x3c0   :  { %v1937_v41 = vld [vmem:[%s2593_s7 + $0x48] ss:$12 sps:$4 sm:$0xff]   ;;  %v1943_v39 = vld [vmem:[%s2593_s7 + $0x64] ss:$12 sps:$4 sm:$0xff]   ;;  %v1941_v43 = vld [vmem:[%s2593_s7 + $0x60] ss:$12 sps:$4 sm:$0xff]  }
 0x3c1   :  { %v2402_v53 = vadd.f32 %v981_v49, %v977_v51  ;;  %v2404_v54 = vadd.f32 %v984_v48, %v980_v52  ;;  %v1004_v57 = vmul.f32 %v2400_v50, %v2400_v50  ;;  %1289 = vmatpush1.bf16.msra.mxu0 %v1929_v29  ;;  %v1944_v48 = vld [vmem:[%s2593_s7 + $0x68] ss:$12 sps:$4 sm:$0xff]   ;;  %v1945_v49 = vld [vmem:[%s2593_s7 + $0x78] ss:$12 sps:$4 sm:$0xff]   ;;  %v1948_v52 = vld [vmem:[%s2593_s7 + $0x80] ss:$12 sps:$4 sm:$0xff]  }
 0x3c2   :  { %1290 = vmatprep.subr.bf16.mxu0 %v1935_v40  ;;  %v1947_v51 = vld [vmem:[%s2593_s7 + $0x7c] ss:$12 sps:$4 sm:$0xff]   ;;  %v1633_v29 = vld [vmem:[%s2592_s9 + $0x1] ss:$0 sm:$0xff] }
 0x3c3   :  { %v1002_v24 = vmul.f32 %v2402_v53, %v2402_v53  ;;  %v993_v58 = vadd.f32 %v2386_v26, %v2402_v53  ;;  %v1005_v61 = vmul.f32 %v2404_v54, %v2404_v54 }
 0x3c5   :  { %v994_v59 = vadd.f32 %v993_v58, %v2400_v50  ;;  %v1006_v56 = vadd.f32 %v1003_v55, %v1002_v24  ;;  %1291 = vmatpush1.bf16.msra.mxu0 %v1933_v42  ;;  %v1951_v55 = vld [vmem:[%s2593_s7 + $0x94] ss:$12 sps:$4 sm:$0xff]   ;;  %v1952_v24 = vld [vmem:[%s2593_s7 + $0x98] ss:$12 sps:$4 sm:$0xff]   ;;  %v1949_v58 = vld [vmem:[%s2593_s7 + $0x90] ss:$12 sps:$4 sm:$0xff]  }
 0x3c6   :  { %1292 = vmatprep.subr.bf16.mxu0 %v1939_v47 }
 0x3c7   :  { %v995_v60 = vadd.f32 %v994_v59, %v2404_v54  ;;  %v1007_v62 = vadd.f32 %v1006_v56, %v1004_v57  ;;  %v1955_v57 = vld [vmem:[%s2593_s7 + $0xac] ss:$12 sps:$4 sm:$0xff]   ;;  %v1956_v59 = vld [vmem:[%s2593_s7 + $0xb0] ss:$12 sps:$4 sm:$0xff]   ;;  %v1953_v56 = vld [vmem:[%s2593_s7 + $0xa8] ss:$12 sps:$4 sm:$0xff]  }
 0x3c9   :  { %v996_v63 = vrot.slane %v995_v60, 4  ;;  %v1008_v0 = vadd.f32 %v1007_v62, %v1005_v61  ;;  %1293 = vmatpush1.bf16.msra.mxu0 %v1937_v41 }
 0x3ca   :  { %1294 = vmatprep.subr.bf16.mxu0 %v1943_v39 }
 0x3cb   :  { %v997_v2 = vadd.f32 %v996_v63, %v995_v60  ;;  %v1009_v3 = vrot.slane %v1008_v0, 4 }
 0x3cd   :  { %v998_v4 = vrot.slane %v997_v2, 2  ;;  %v1010_v6 = vadd.f32 %v1009_v3, %v1008_v0  ;;  %1295 = vmatpush1.bf16.msra.mxu0 %v1941_v43 }
 0x3ce   :  { %1296 = vmatprep.subr.bf16.mxu0 %v1947_v51 }
 0x3cf   :  { %v999_v8 = vadd.f32 %v998_v4, %v997_v2  ;;  %v1011_v11 = vrot.slane %v1010_v6, 2 }
 0x3d1   :  { %v1000_v12 = vrot.slane %v999_v8, 1  ;;  %v1012_v13 = vadd.f32 %v1011_v11, %v1010_v6  ;;  %1297 = vmatpush1.bf16.msra.mxu0 %v1945_v49 }
 0x3d2   :  { %1298 = vmatprep.subr.bf16.mxu0 %v1951_v55 }
 0x3d3   :  { %v1013_v14 = vrot.slane %v1012_v13, 1  ;;  %v1001_v15 = vadd.f32 %v1000_v12, %v999_v8 }
 0x3d5   :  { %v1014_v16 = vadd.f32 %v1013_v14, %v1012_v13  ;;  %1299 = vmatpush1.bf16.msra.mxu0 %v1949_v58  ;;  %v1631_v14 = vld [vmem:[%s2591_s8 + $0x1] sm:$0x1] }
 0x3d6   :  { %1300 = vmatprep.subr.bf16.mxu0 %v1955_v57 }
 0x3d7   :  { %v1015_v18 = vsel %vm535_vm6, %v1001_v15, %v1014_v16 }
 0x3d8   :  { %v1016_v21 = vpack.c.bf16 %v1015_v18, %v1015_v18 }
 0x3d9   :  { %1301 = vmatpush1.bf16.msra.mxu0 %v1953_v56 }
 0x3da   :  { %1809 = vmatmul.mubr.bf16.vlgmr.msra.gmra.mrb[24].mxu1 %v1016_v21  ;;  %1832 = vmatprep.subr.bf16.mxu0 %v1967_v10 }
 0x3db   :  { %1813 = vmatpush3.bf16.msra.mxu1 %v1928_v25 }
 0x3dc   :  { %1814 = vmatprep.subr.bf16.mxu1 %v1932_v38 }
 0x3df   :  { %1815 = vmatpush3.bf16.msra.mxu1 %v1932_v38 }
 0x3e0   :  { %1816 = vmatprep.subr.bf16.mxu1 %v1936_v45 }
 0x3e3   :  { %1817 = vmatpush3.bf16.msra.mxu1 %v1936_v45 }
 0x3e4   :  { %1818 = vmatprep.subr.bf16.mxu1 %v1940_v46 }
 0x3e7   :  { %1819 = vmatpush3.bf16.msra.mxu1 %v1940_v46 }
 0x3e8   :  { %1820 = vmatprep.subr.bf16.mxu1 %v1944_v48 }
 0x3eb   :  { %1821 = vmatpush3.bf16.msra.mxu1 %v1944_v48 }
 0x3ec   :  { %1822 = vmatprep.subr.bf16.mxu1 %v1948_v52 }
 0x3ef   :  { %1823 = vmatpush3.bf16.msra.mxu1 %v1948_v52 }
 0x3f0   :  { %1824 = vmatprep.subr.bf16.mxu1 %v1952_v24 }
 0x3f3   :  { %1825 = vmatpush3.bf16.msra.mxu1 %v1952_v24  ;;  %v1963_v24 = vld [vmem:[%s2588_s10] sm:$0xff]  }
 0x3f4   :  { %1826 = vmatprep.subr.bf16.mxu1 %v1956_v59 }
 0x3f7   :  { %1827 = vmatpush3.bf16.msra.mxu1 %v1956_v59 }
 0x4ad   :  { %v1051_v60 = vpop.f32.mrb[24].mxu1 }
 0x4ae   :  { %v1057_v61 = vmul.f32 0.001953125, %v1051_v60  ;;  %v1810_v62 = vpop.f32.mrb[25].mxu1 }
 0x4af   :  { %v1054_v63 = vpop.f32.mrb[26].mxu1 }
 0x4b0   :  { %v1058_v0 = vmul.f32 %v1057_v61, %v1057_v61  ;;  %v1811_v2 = vpop.f32.mrb[27].mxu1  ;;  %v1087_v15 = vrot.slane %v1057_v61, %v2339_v9 }
 0x4b2   :  { %v1060_v3 = vrot.slane %v1058_v0, 7  ;;  %v1088_v21 = vsub.f32 %v2402_v53, %v1087_v15  ;;  %v1089_v22 = vsub.f32 %v2386_v26, %v1087_v15  ;;  %v1090_v23 = vsub.f32 %v2400_v50, %v1087_v15 }
 0x4b3   :  { %v1091_v25 = vsub.f32 %v2404_v54, %v1087_v15 }
 0x4b4   :  { %v1062_v4 = vsub.f32 %v1057_v61, %v1060_v3 }
 0x4b6   :  { %v1063_v6 = vmax.f32 %v1062_v4, 0.0 }
 0x4b8   :  { %v1064_v8 = vadd.f32 1e-05, %v1063_v6 }
 0x4ba   :  { %1959 = vrsqrt.f32 %v1064_v8 }
 0x4c4   :  { %v1960_v11 = vpop.eup %1959 }
 0x4c5   :  { %v1073_v12 = vrot.slane %v1960_v11, %v2336_v7 }
 0x4c7   :  { %v1074_v13 = vcombine.high %v1073_v12, %v1073_v12 }
 0x4c9   :  { %v1081_v16 = vrot.slane %v1074_v13, %v2336_v7 }
 0x4cb   :  { %v1083_v18 = vmul.f32 %v1631_v14, %v1081_v16 }
 0x4cd   :  { %v1096_v28 = vrot.slane %v1083_v18, %v2339_v9  ;;  %v1964_v18 = vld [vmem:[%s2589_s3 + $0x10] sm:$0xff] }
 0x4cf   :  { %v1098_v38 = vmul.f32 %v1096_v28, %v1088_v21  ;;  %v1099_v40 = vmul.f32 %v1096_v28, %v1089_v22  ;;  %v1100_v42 = vmul.f32 %v1096_v28, %v1090_v23  ;;  %v1101_v45 = vmul.f32 %v1096_v28, %v1091_v25 }
 0x4d1   :  { %v1108_v47 = vadd.f32 %v1633_v29, %v1098_v38  ;;  %v1109_v41 = vadd.f32 %v1633_v29, %v1099_v40  ;;  %v1110_v46 = vadd.f32 %v1633_v29, %v1100_v42  ;;  %v1111_v53 = vadd.f32 %v1633_v29, %v1101_v45  ;;  %v1965_v29 = vld [vmem:[%s2589_s3 + $0x18] sm:$0xff] }
 0x4d3   :  { %vm1112_vm11 = vcmp.gt.f32.partialorder %v1108_v47, 0.0  ;;  %vm1113_vm12 = vcmp.gt.f32.partialorder %v1109_v41, 0.0  ;;  %v1116_v26 = vmul.f32 0.2, %v1108_v47  ;;  %v1117_v50 = vmul.f32 0.2, %v1109_v41 }
 0x4d4   :  { %vm1114_vm13 = vcmp.gt.f32.partialorder %v1110_v46, 0.0  ;;  %vm1115_vm14 = vcmp.gt.f32.partialorder %v1111_v53, 0.0  ;;  %v1118_v54 = vmul.f32 0.2, %v1110_v46  ;;  %v1119_v39 = vmul.f32 0.2, %v1111_v53 }
 0x4d5   :  { %v1120_v43 = vsel %vm1112_vm11, %v1108_v47, %v1116_v26  ;;  %v1121_v48 = vsel %vm1113_vm12, %v1109_v41, %v1117_v50 }
 0x4d6   :  { %v1124_v49 = vpack.c.bf16 %v1121_v48, %v1120_v43  ;;  %v1122_v51 = vsel %vm1114_vm13, %v1110_v46, %v1118_v54  ;;  %v1123_v52 = vsel %vm1115_vm14, %v1111_v53, %v1119_v39 }
 0x4d7   :  { %v1125_v55 = vpack.c.bf16 %v1123_v52, %v1122_v51 }
 0x4d8   :  { %1319 = vmatmul.mubr.bf16.vlgmr.msra.gmra.mrb[16].mxu0 %v1124_v49  ;;  %1828 = vmatprep.mubr.bf16.mxu1 %v1124_v49 }
 0x4d9   :  { %1829 = vmatmul.mubr.bf16.vlgmr.msra.gmra.mrb[28].mxu1 %v1125_v55  ;;  %1328 = vmatprep.mubr.bf16.mxu0 %v1966_v1 }
 0x4da   :  { %1833 = vmatpush3.bf16.msra.mxu0 %v1963_v24 }
 0x4db   :  { %1834 = vmatprep.subr.bf16.mxu0 %v1967_v10 }
 0x4de   :  { %1835 = vmatpush3.bf16.msra.mxu0 %v2196_v30 }
 0x4df   :  { %1836 = vmatprep.subr.bf16.mxu0 %v1967_v10 }
 0x4e0   :  { %1329 = vmatmul.mubr.bf16.gmra.mrb[20].mxu0 %v1125_v55 }
 0x4e1   :  { %1848 = vmatprep.mubr.msk.bf16.mxu0 %vm1968_vm1, %v1967_v10 }
 0x4e2   :  { %1837 = vmatpush3.bf16.msra.mxu0 %v2203_v31 }
 0x4e3   :  { %1838 = vmatprep.subr.bf16.mxu0 %v1967_v10 }
 0x4e6   :  { %1839 = vmatpush3.bf16.msra.mxu0 %v2210_v32 }
 0x4e7   :  { %1840 = vmatprep.subr.bf16.mxu0 %v1967_v10 }
 0x4ea   :  { %1841 = vmatpush3.bf16.msra.mxu0 %v2217_v33 }
 0x4eb   :  { %1842 = vmatprep.subr.bf16.mxu0 %v1967_v10 }
 0x4ee   :  { %1843 = vmatpush3.bf16.msra.mxu0 %v2224_v34 }
 0x4ef   :  { %1844 = vmatprep.subr.bf16.mxu0 %v1967_v10 }
 0x4f2   :  { %1845 = vmatpush3.bf16.msra.mxu0 %v2231_v35 }
 0x4f3   :  { %1846 = vmatprep.subr.bf16.mxu0 %v1967_v10 }
 0x4f6   :  { %1847 = vmatpush3.bf16.msra.mxu0 %v2237_v36 }
 0x5ab   :  { %v1320_v1 = vpop.f32.mrb[16].mxu0 }
 0x5ac   :  { %v1322_v30 = vpop.f32.mrb[17].mxu0  ;;  %v1830_v31 = vpop.f32.mrb[28].mxu1  ;;  %v1388_v57 = vrot.slane %v1320_v1, 7 }
 0x5ad   :  { %v1324_v32 = vpop.f32.mrb[18].mxu0  ;;  %v1373_v58 = vpop.f32.mrb[29].mxu1  ;;  %v1398_v61 = vrot.slane %v1830_v31, 1 }
 0x5ae   :  { %v1389_v59 = vrot.slane %v1324_v32, 7  ;;  %v1396_v33 = vrot.slane %v1373_v58, 1  ;;  %v1326_v56 = vpop.f32.mrb[19].mxu0  ;;  %v1831_v60 = vpop.f32.mrb[30].mxu1 }
 0x5af   :  { %v1399_v34 = vrot.slane %v1831_v60, 1  ;;  %v1376_v62 = vpop.f32.mrb[31].mxu1 }
 0x5b0   :  { %v1394_v35 = vsel %vm415_vm4, %v1388_v57, %v1389_v59  ;;  %v1397_v63 = vrot.slane %v1376_v62, 1 }
 0x5b1   :  { %v1405_v10 = vmul.f32 %v1394_v35, %v2130_v44  ;;  %v1400_v36 = vsel %vm424_vm5, %v1398_v61, %v1399_v34  ;;  %v1403_v0 = vsel %vm424_vm5, %v1399_v34, %v1396_v33 }
 0x5b2   :  { %v1401_v2 = vsel %vm424_vm5, %v1397_v63, %v1398_v61  ;;  %v1402_v3 = vsel %vm424_vm5, %v1396_v33, %v1397_v63  ;;  %v1414_v25 = vmul.f32 %v2157_v5, %v1400_v36  ;;  %v1415_v40 = vmul.f32 %v2190_v27, %v1403_v0 }
 0x5b3   :  { %v1409_v4 = vadd.f32 %v1405_v10, %v1326_v56  ;;  %v1413_v6 = vmul.f32 %v2183_v20, %v1401_v2  ;;  %v1330_v8 = vpop.f32.mrb[20].mxu0  ;;  %v1412_v42 = vmul.f32 %v2178_v19, %v1402_v3 }
 0x5b4   :  { %v1390_v11 = vrot.slane %v1330_v8, 7  ;;  %v1332_v12 = vpop.f32.mrb[21].mxu0 }
 0x5b5   :  { %v2538_v13 = vadd.f32 %v1413_v6, %v1409_v4  ;;  %v1334_v44 = vpop.f32.mrb[22].mxu0  ;;  %v1658_v6 = vld [vmem:[%s2591_s8 + $0x2] sm:$0x1] }
 0x5b6   :  { %v1393_v14 = vsel %vm415_vm4, %v1389_v59, %v1390_v11  ;;  %v1391_v15 = vrot.slane %v1334_v44, 7  ;;  %v1336_v16 = vpop.f32.mrb[23].mxu0 }
 0x5b7   :  { %v1406_v21 = vmul.f32 %v1964_v18, %v1393_v14  ;;  %v1434_v53 = vmul.f32 %v2538_v13, %v2538_v13 }
 0x5b8   :  { %v1395_v22 = vsel %vm415_vm4, %v1391_v15, %v1388_v57  ;;  %v1392_v20 = vsel %vm415_vm4, %v1390_v11, %v1391_v15 }
 0x5b9   :  { %v1410_v23 = vadd.f32 %v1406_v21, %v1332_v12  ;;  %v1404_v28 = vmul.f32 %v1395_v22, %v2172_v17  ;;  %v1407_v38 = vmul.f32 %v1965_v29, %v1392_v20  ;;  %v1660_v21 = vld [vmem:[%s2592_s9 + $0x2] ss:$0 sm:$0xff] }
 0x5bb   :  { %v1418_v45 = vadd.f32 %v1414_v25, %v1410_v23  ;;  %v1408_v47 = vadd.f32 %v1404_v28, %v1322_v30  ;;  %v1411_v41 = vadd.f32 %v1407_v38, %v1336_v16 }
 0x5bd   :  { %v1416_v46 = vadd.f32 %v1412_v42, %v1408_v47  ;;  %v1419_v37 = vadd.f32 %v1415_v40, %v1411_v41  ;;  %v1435_v26 = vmul.f32 %v1418_v45, %v1418_v45 }
 0x5bf   :  { %v1433_v5 = vmul.f32 %v1416_v46, %v1416_v46  ;;  %v1424_v17 = vadd.f32 %v2538_v13, %v1416_v46  ;;  %v1436_v43 = vmul.f32 %v1419_v37, %v1419_v37 }
 0x5c1   :  { %v1425_v50 = vadd.f32 %v1424_v17, %v1418_v45  ;;  %v1437_v54 = vadd.f32 %v1434_v53, %v1433_v5 }
 0x5c3   :  { %v1426_v39 = vadd.f32 %v1425_v50, %v1419_v37  ;;  %v1438_v48 = vadd.f32 %v1437_v54, %v1435_v26 }
 0x5c5   :  { %v1427_v27 = vrot.slane %v1426_v39, 4  ;;  %v1439_v49 = vadd.f32 %v1438_v48, %v1436_v43 }
 0x5c7   :  { %v1428_v19 = vadd.f32 %v1427_v27, %v1426_v39  ;;  %v1440_v51 = vrot.slane %v1439_v49, 4 }
 0x5c9   :  { %v1429_v52 = vrot.slane %v1428_v19, 2  ;;  %v1441_v55 = vadd.f32 %v1440_v51, %v1439_v49 }
 0x5cb   :  { %v1430_v24 = vadd.f32 %v1429_v52, %v1428_v19  ;;  %v1442_v1 = vrot.slane %v1441_v55, 2 }
 0x5cd   :  { %v1431_v30 = vrot.slane %v1430_v24, 1  ;;  %v1443_v31 = vadd.f32 %v1442_v1, %v1441_v55 }
 0x5cf   :  { %v1444_v32 = vrot.slane %v1443_v31, 1  ;;  %v1432_v58 = vadd.f32 %v1431_v30, %v1430_v24 }
 0x5d1   :  { %v1445_v57 = vadd.f32 %v1444_v32, %v1443_v31 }
 0x5d3   :  { %v1446_v59 = vsel %vm535_vm6, %v1432_v58, %v1445_v57 }
 0x5d4   :  { %v1447_v33 = vpack.c.bf16 %v1446_v59, %v1446_v59 }
 0x5d6   :  { %1849 = vmatmul.mubr.bf16.vlgmr.msra.gmra.mrb[24].mxu0 %v1447_v33 }
 0x6a9   :  { %v1482_v56 = vpop.f32.mrb[24].mxu0 }
 0x6aa   :  { %v1488_v60 = vmul.f32 0.001953125, %v1482_v56  ;;  %v1850_v61 = vpop.f32.mrb[25].mxu0 }
 0x6ab   :  { %v1485_v34 = vpop.f32.mrb[26].mxu0 }
 0x6ac   :  { %v1489_v62 = vmul.f32 %v1488_v60, %v1488_v60  ;;  %v1851_v35 = vpop.f32.mrb[27].mxu0  ;;  %v1518_v8 = vrot.slane %v1488_v60, %v2339_v9 }
 0x6ae   :  { %v1491_v63 = vrot.slane %v1489_v62, 7  ;;  %v1519_v44 = vsub.f32 %v1416_v46, %v1518_v8  ;;  %v1520_v14 = vsub.f32 %v2538_v13, %v1518_v8  ;;  %v1521_v15 = vsub.f32 %v1418_v45, %v1518_v8 }
 0x6af   :  { %v1522_v16 = vsub.f32 %v1419_v37, %v1518_v8 }
 0x6b0   :  { %v1493_v10 = vsub.f32 %v1488_v60, %v1491_v63 }
 0x6b2   :  { %v1494_v36 = vmax.f32 %v1493_v10, 0.0 }
 0x6b4   :  { %v1495_v0 = vadd.f32 1e-05, %v1494_v36 }
 0x6b6   :  { %1961 = vrsqrt.f32 %v1495_v0 }
 0x6c0   :  { %v1962_v2 = vpop.eup %1961 }
 0x6c1   :  { %v1504_v3 = vrot.slane %v1962_v2, %v2336_v7 }
 0x6c3   :  { %v1505_v4 = vcombine.high %v1504_v3, %v1504_v3 }
 0x6c5   :  { %v1512_v11 = vrot.slane %v1505_v4, %v2336_v7 }
 0x6c7   :  { %v1514_v12 = vmul.f32 %v1658_v6, %v1512_v11 }
 0x6c9   :  { %v1527_v18 = vrot.slane %v1514_v12, %v2339_v9 }
 0x6cb   :  { %v1529_v22 = vmul.f32 %v1527_v18, %v1519_v44  ;;  %v1530_v20 = vmul.f32 %v1527_v18, %v1520_v14  ;;  %v1531_v23 = vmul.f32 %v1527_v18, %v1521_v15  ;;  %v1532_v25 = vmul.f32 %v1527_v18, %v1522_v16 }
 0x6cd   :  { %v1539_v28 = vadd.f32 %v1660_v21, %v1529_v22  ;;  %v1540_v29 = vadd.f32 %v1660_v21, %v1530_v20  ;;  %v1541_v38 = vadd.f32 %v1660_v21, %v1531_v23  ;;  %v1542_v7 = vadd.f32 %v1660_v21, %v1532_v25 }
 0x6cf   :  { %vm1543_vm15 = vcmp.gt.f32.partialorder %v1539_v28, 0.0  ;;  %vm1544_vm0 = vcmp.gt.f32.partialorder %v1540_v29, 0.0  ;;  %vm1545_vm1 = vcmp.gt.f32.partialorder %v1541_v38, 0.0  ;;  %vm1546_vm2 = vcmp.gt.f32.partialorder %v1542_v7, 0.0 }
 0x6d0   :  { %v1547_v13 = vmul.f32 0.2, %v1539_v28  ;;  %v1548_v40 = vmul.f32 0.2, %v1540_v29  ;;  %v1549_v42 = vmul.f32 0.2, %v1541_v38 }
 0x6d1   :  { %v1550_v9 = vmul.f32 0.2, %v1542_v7 }
 0x6d2   :  { %v1551_v45 = vsel %vm1543_vm15, %v1539_v28, %v1547_v13  ;;  %v1552_v47 = vsel %vm1544_vm0, %v1540_v29, %v1548_v40  ;;  %v1553_v41 = vsel %vm1545_vm1, %v1541_v38, %v1549_v42 }
 0x6d3   :  { %v1554_v46 = vsel %vm1546_vm2, %v1542_v7, %v1550_v9  ;;  %1555 = vst [vmem:[%s2594_s11] sm:$0xff] %v1551_v45  ;;  %1556 = vst [vmem:[%s2594_s11 + $0x8] sm:$0xff] %v1552_v47 }
 0x6d4   :  { %1557 = vst [vmem:[%s2594_s11 + $0x10] sm:$0xff] %v1553_v41  ;;  %1558 = vst [vmem:[%s2594_s11 + $0x18] sm:$0xff] %v1554_v46 }

</bundles_post_ra>
